<compile_context>
chip_gen: v7x
topology: tpu7x:2x2x1
jax: 0.10.0
libtpu: 0.0.40
codegen_flags: <defaults>
</compile_context>

<pallas_src>
import functools
import math

import jax
import jax.numpy as jnp
from jax.experimental import pallas as pl
from jax.experimental.pallas import tpu as pltpu

# TODO(synk): PyTorch nn.GELU()/F.gelu default is the exact erf-GELU; the
# tanh approximation is used here (and in the reference) because erf lowering
# in Mosaic is not guaranteed.  Max abs deviation ~3e-3, well below the bf16
# operand noise.
def _gelu(x):
    return jax.nn.gelu(x, approximate=True)


# ---------------------------------------------------------------------------
# Tiling helpers
# ---------------------------------------------------------------------------
def _pick_tile(size, cap, align):
    """Largest block <= cap that tiles `size` and respects TPU (8,128) tiling:
    either the full dim, or a multiple of `align` that divides `size`."""
    if size <= cap:
        return size
    t = (cap // align) * align
    while t >= align:
        if size % t == 0:
            return t
        t -= align
    return size  # fallback: full dim (always legal)


_COMPILER_PARAMS = pltpu.CompilerParams(
    dimension_semantics=("parallel", "parallel", "arbitrary"),
    # Tiny actual usage (<4 MiB); 32 MiB scoped limit is safe on v5e/v6e/v7x.
    vmem_limit_bytes=32 * 1024 * 1024,
)


# ---------------------------------------------------------------------------
# Pallas kernels
# ---------------------------------------------------------------------------
def _linear_act_kernel(x_ref, w_ref, b_ref, o_ref, acc_ref, *, activation):
    """o = act(x @ w + b), accumulated over the K grid axis in f32 scratch."""
    k = pl.program_id(2)

    @pl.when(k == 0)
    def _():
        acc_ref[...] = jnp.zeros_like(acc_ref)

    acc_ref[...] += jnp.dot(x_ref[...], w_ref[...],
                            preferred_element_type=jnp.float32)

    @pl.when(k == pl.num_programs(2) - 1)
    def _():
        y = acc_ref[...] + b_ref[...].astype(jnp.float32)
        if activation == "gelu":
            y = _gelu(y)
        o_ref[...] = y.astype(o_ref.dtype)


def _geglu_kernel(x_ref, wa_ref, wg_ref, ba_ref, bg_ref, o_ref,
                  acc_a_ref, acc_g_ref):
    """o = (x @ wa + ba) * gelu(x @ wg + bg): fused GEGLU projection.

    Both halves of the (dim, 2*inner) projection are accumulated in one pass
    over x, so x is read from HBM once and no chunk/concat is materialised.
    """
    k = pl.program_id(2)

    @pl.when(k == 0)
    def _():
        acc_a_ref[...] = jnp.zeros_like(acc_a_ref)
        acc_g_ref[...] = jnp.zeros_like(acc_g_ref)

    x = x_ref[...]
    acc_a_ref[...] += jnp.dot(x, wa_ref[...],
                              preferred_element_type=jnp.float32)
    acc_g_ref[...] += jnp.dot(x, wg_ref[...],
                              preferred_element_type=jnp.float32)

    @pl.when(k == pl.num_programs(2) - 1)
    def _():
        a = acc_a_ref[...] + ba_ref[...].astype(jnp.float32)
        g = acc_g_ref[...] + bg_ref[...].astype(jnp.float32)
        o_ref[...] = (a * _gelu(g)).astype(o_ref.dtype)


# ---------------------------------------------------------------------------
# Wrappers
# ---------------------------------------------------------------------------
def pallas_linear(x2d, w, b, *, activation=None, out_dtype=jnp.float32,
                  tm_cap=256, tn_cap=256, tk_cap=512):
    """y = act(x2d @ w + b). x2d: (M, K) bf16, w: (K, N) bf16, b: (1, N) f32."""
    M, K = x2d.shape
    Kw, N = w.shape
    assert K == Kw
    tm = _pick_tile(M, tm_cap, 8)
    tn = _pick_tile(N, tn_cap, 128)
    tk = _pick_tile(K, tk_cap, 128)
    grid = (M // tm, N // tn, K // tk)

    kernel = functools.partial(_linear_act_kernel, activation=activation)
    return pl.pallas_call(
        kernel,
        out_shape=jax.ShapeDtypeStruct((M, N), out_dtype),
        grid=grid,
        in_specs=[pl.BlockSpec((tm, tk), lambda i, j, k: (i, k)),
                  pl.BlockSpec((tk, tn), lambda i, j, k: (k, j)),
                  pl.BlockSpec((1, tn), lambda i, j, k: (0, j))],
        out_specs=pl.BlockSpec((tm, tn), lambda i, j, k: (i, j)),
        scratch_shapes=[pltpu.VMEM((tm, tn), jnp.float32)],
        compiler_params=_COMPILER_PARAMS,
    )(x2d, w, b)


def pallas_geglu(x2d, wa, wg, ba, bg, *, out_dtype=jnp.bfloat16,
                 tm_cap=256, tn_cap=256, tk_cap=512):
    """y = (x2d @ wa + ba) * gelu(x2d @ wg + bg).  All weight args bf16."""
    M, K = x2d.shape
    Kw, N = wa.shape
    assert K == Kw and wg.shape == (K, N)
    tm = _pick_tile(M, tm_cap, 8)
    tn = _pick_tile(N, tn_cap, 128)
    tk = _pick_tile(K, tk_cap, 128)
    grid = (M // tm, N // tn, K // tk)

    return pl.pallas_call(
        _geglu_kernel,
        out_shape=jax.ShapeDtypeStruct((M, N), out_dtype),
        grid=grid,
        in_specs=[pl.BlockSpec((tm, tk), lambda i, j, k: (i, k)),
                  pl.BlockSpec((tk, tn), lambda i, j, k: (k, j)),
                  pl.BlockSpec((tk, tn), lambda i, j, k: (k, j)),
                  pl.BlockSpec((1, tn), lambda i, j, k: (0, j)),
                  pl.BlockSpec((1, tn), lambda i, j, k: (0, j))],
        out_specs=pl.BlockSpec((tm, tn), lambda i, j, k: (i, j)),
        scratch_shapes=[pltpu.VMEM((tm, tn), jnp.float32),
                        pltpu.VMEM((tm, tn), jnp.float32)],
        compiler_params=_COMPILER_PARAMS,
    )(x2d, wa, wg, ba, bg)


def feedforward(x, params, *, glu=False):
    """FeedForward.forward: project_in (Linear+GELU or GEGLU) -> Dropout(0) -> Linear.

    x: (B, S, dim) f32.  Weights in params are pre-transposed (in, out) bf16,
    biases (1, out) f32.
    """
    B, S, dim = x.shape
    x2d = x.reshape(B * S, dim).astype(jnp.bfloat16)   # bf16 MXU operand

    if glu:
        w = params["w_proj"]            # (dim, 2*inner), columns = [x-half | gate-half]
        b = params["b_proj"]            # (1, 2*inner)
        inner = w.shape[1] // 2
        # Split mirrors torch.chunk(2, dim=-1) on the projection output.
        h = pallas_geglu(x2d, w[:, :inner], w[:, inner:],
                         b[:, :inner], b[:, inner:], out_dtype=jnp.bfloat16)
    else:
        h = pallas_linear(x2d, params["w1"], params["b1"],
                          activation="gelu", out_dtype=jnp.bfloat16)

    # nn.Dropout(p=0.0) is the identity.
    y = pallas_linear(h, params["w2"], params["b2"],
                      activation=None, out_dtype=jnp.float32)
    return y.reshape(B, S, -1)


# ---------------------------------------------------------------------------
# Pure-JAX reference (mirrors the PyTorch forward) for verification
# ---------------------------------------------------------------------------
def reference_forward(x, params, *, glu=False):
    f32 = lambda a: a.astype(jnp.float32)
    x2d = x.reshape(-1, x.shape[-1]).astype(jnp.float32)
    if glu:
        proj = x2d @ f32(params["w_proj"]) + params["b_proj"]
        a, g = jnp.split(proj, 2, axis=-1)
        h = a * _gelu(g)
    else:
        h = _gelu(x2d @ f32(params["w1"]) + params["b1"])
    y = h @ f32(params["w2"]) + params["b2"]
    return y.reshape(*x.shape[:-1], -1)


# ---------------------------------------------------------------------------
if __name__ == "__main__":
    B, S, dim, mult = 2, 256, 64, 4
    inner = int(dim * mult)            # 256
    dim_out = dim

    key = jax.random.PRNGKey(0)
    ks = jax.random.split(key, 8)
    x = jax.random.normal(ks[0], (B, S, dim), jnp.float32)

    s1 = 1.0 / math.sqrt(dim)
    s2 = 1.0 / math.sqrt(inner)
    # Deterministic synthetic parameters (shapes from __init__; no checkpoint).
    params_plain = {
        "w1": (jax.random.normal(ks[1], (dim, inner), jnp.float32) * s1).astype(jnp.bfloat16),
        "b1": jax.random.normal(ks[2], (1, inner), jnp.float32) * s1,
        "w2": (jax.random.normal(ks[3], (inner, dim_out), jnp.float32) * s2).astype(jnp.bfloat16),
        "b2": jax.random.normal(ks[4], (1, dim_out), jnp.float32) * s2,
    }
    params_glu = {
        "w_proj": (jax.random.normal(ks[5], (dim, 2 * inner), jnp.float32) * s1).astype(jnp.bfloat16),
        "b_proj": jax.random.normal(ks[6], (1, 2 * inner), jnp.float32) * s1,
        "w2": params_plain["w2"],
        "b2": params_plain["b2"],
    }

    # glu=False path: Linear -> GELU -> Linear
    out = jax.block_until_ready(feedforward(x, params_plain, glu=False))
    ref = reference_forward(x, params_plain, glu=False)
    assert out.shape == (B, S, dim_out)
    err = float(jnp.max(jnp.abs(out - ref)))
    assert jnp.allclose(out, ref, atol=5e-2, rtol=5e-2), f"plain max_err={err}"

    # glu=True path: GEGLU -> Linear
    out_g = jax.block_until_ready(feedforward(x, params_glu, glu=True))
    ref_g = reference_forward(x, params_glu, glu=True)
    assert out_g.shape == (B, S, dim_out)
    err_g = float(jnp.max(jnp.abs(out_g - ref_g)))
    assert jnp.allclose(out_g, ref_g, atol=5e-2, rtol=5e-2), f"glu max_err={err_g}"

    print("KERNEL_OK")
</pallas_src>

<mosaic_0001>
module attributes {stable_mosaic.version = 11 : i64} {
  func.func @_linear_act_kernel(%arg0: i32, %arg1: i32, %arg2: i32, %arg3: memref<256x64xbf16, #tpu.memory_space<vmem>>, %arg4: memref<64x256xbf16, #tpu.memory_space<vmem>>, %arg5: memref<1x256xf32, #tpu.memory_space<vmem>>, %arg6: memref<256x256xbf16, #tpu.memory_space<vmem>>, %arg7: memref<256x256xf32, #tpu.memory_space<vmem>>) attributes {dimension_semantics = [#tpu.dimension_semantics<parallel>, #tpu.dimension_semantics<parallel>, #tpu.dimension_semantics<arbitrary>], iteration_bounds = array<i64: 2, 1, 1>, scalar_prefetch = 0 : i64, scratch_operands = 1 : i64, tpu.core_type = #tpu.core_type<tc>, window_params = [{transform_indices = @transform_0, window_bounds = array<i64: 256, 64>}, {transform_indices = @transform_1, window_bounds = array<i64: 64, 256>}, {transform_indices = @transform_2, window_bounds = array<i64: 1, 256>}, {transform_indices = @transform_3, window_bounds = array<i64: 256, 256>}]} {
    %c0_i32 = arith.constant 0 : i32
    %0 = arith.cmpi eq, %arg2, %c0_i32 : i32
    %1 = arith.extui %0 : i1 to i32
    %c0_i32_0 = arith.constant 0 : i32
    %2 = arith.cmpi ne, %1, %c0_i32_0 : i32
    scf.if %2 {
      %cst_10 = arith.constant 0.000000e+00 : f32
      %12 = vector.broadcast %cst_10 : f32 to vector<256x256xf32>
      %c0_11 = arith.constant 0 : index
      %c0_12 = arith.constant 0 : index
      %13 = vector.load %arg7[%c0_11, %c0_12] : memref<256x256xf32, #tpu.memory_space<vmem>>, vector<256x256xf32>
      tpu.vector_store %arg7[%c0_11, %c0_12], %12 {strides = array<i32>} : memref<256x256xf32, #tpu.memory_space<vmem>>, vector<256x256xf32>,
    } else {
    }
    %c0 = arith.constant 0 : index
    %c0_1 = arith.constant 0 : index
    %3 = vector.load %arg7[%c0, %c0_1] : memref<256x256xf32, #tpu.memory_space<vmem>>, vector<256x256xf32>
    %c0_2 = arith.constant 0 : index
    %c0_3 = arith.constant 0 : index
    %4 = vector.load %arg3[%c0_2, %c0_3] : memref<256x64xbf16, #tpu.memory_space<vmem>>, vector<256x64xbf16>
    %c0_4 = arith.constant 0 : index
    %c0_5 = arith.constant 0 : index
    %5 = vector.load %arg4[%c0_4, %c0_5] : memref<64x256xbf16, #tpu.memory_space<vmem>>, vector<64x256xbf16>
    %cst = arith.constant dense<0.000000e+00> : vector<256x256xf32>
    %6 = tpu.matmul %4, %5, %cst {dimension_numbers = #tpu.dot_dimension_numbers<[1], [0], [0], [1], [0, 0, 1, 1], [], []>} : vector<256x64xbf16>, vector<64x256xbf16>, vector<256x256xf32> -> vector<256x256xf32>
    %7 = arith.addf %3, %6 : vector<256x256xf32>
    %c0_6 = arith.constant 0 : index
    %c0_7 = arith.constant 0 : index
    %8 = vector.load %arg7[%c0_6, %c0_7] : memref<256x256xf32, #tpu.memory_space<vmem>>, vector<256x256xf32>
    tpu.vector_store %arg7[%c0_6, %c0_7], %7 {strides = array<i32>} : memref<256x256xf32, #tpu.memory_space<vmem>>, vector<256x256xf32>,
    %c0_i32_8 = arith.constant 0 : i32
    %9 = arith.cmpi eq, %arg2, %c0_i32_8 : i32
    %10 = arith.extui %9 : i1 to i32
    %c0_i32_9 = arith.constant 0 : i32
    %11 = arith.cmpi ne, %10, %c0_i32_9 : i32
    scf.if %11 {
      %c0_10 = arith.constant 0 : index
      %c0_11 = arith.constant 0 : index
      %12 = vector.load %arg7[%c0_10, %c0_11] : memref<256x256xf32, #tpu.memory_space<vmem>>, vector<256x256xf32>
      %c0_12 = arith.constant 0 : index
      %c0_13 = arith.constant 0 : index
      %13 = vector.load %arg5[%c0_12, %c0_13] : memref<1x256xf32, #tpu.memory_space<vmem>>, vector<1x256xf32>
      %14 = vector.broadcast %13 : vector<1x256xf32> to vector<256x256xf32>
      %15 = arith.addf %12, %14 : vector<256x256xf32>
      %16 = arith.mulf %15, %15 : vector<256x256xf32>
      %17 = arith.mulf %15, %16 : vector<256x256xf32>
      %cst_14 = arith.constant 4.471500e-02 : f32
      %18 = vector.broadcast %cst_14 : f32 to vector<256x256xf32>
      %19 = arith.mulf %18, %17 : vector<256x256xf32>
      %20 = arith.addf %15, %19 : vector<256x256xf32>
      %cst_15 = arith.constant 0.797884583 : f32
      %21 = vector.broadcast %cst_15 : f32 to vector<256x256xf32>
      %22 = arith.mulf %21, %20 : vector<256x256xf32>
      %23 = math.tanh %22 : vector<256x256xf32>
      %cst_16 = arith.constant 1.000000e+00 : f32
      %24 = vector.broadcast %cst_16 : f32 to vector<256x256xf32>
      %25 = arith.addf %24, %23 : vector<256x256xf32>
      %cst_17 = arith.constant 5.000000e-01 : f32
      %26 = vector.broadcast %cst_17 : f32 to vector<256x256xf32>
      %27 = arith.mulf %26, %25 : vector<256x256xf32>
      %28 = arith.mulf %15, %27 : vector<256x256xf32>
      %29 = arith.truncf %28 : vector<256x256xf32> to vector<256x256xbf16>
      %c0_18 = arith.constant 0 : index
      %c0_19 = arith.constant 0 : index
      %30 = vector.load %arg6[%c0_18, %c0_19] : memref<256x256xbf16, #tpu.memory_space<vmem>>, vector<256x256xbf16>
      tpu.vector_store %arg6[%c0_18, %c0_19], %29 {strides = array<i32>} : memref<256x256xbf16, #tpu.memory_space<vmem>>, vector<256x256xbf16>,
    } else {
    }
    return
  }
  func.func @transform_0(%arg0: i32, %arg1: i32, %arg2: i32) -> (i32, i32) {
    %c0_i32 = arith.constant 0 : i32
    return %arg0, %arg2 : i32, i32
  }
  func.func @transform_1(%arg0: i32, %arg1: i32, %arg2: i32) -> (i32, i32) {
    %c0_i32 = arith.constant 0 : i32
    return %arg2, %arg1 : i32, i32
  }
  func.func @transform_2(%arg0: i32, %arg1: i32, %arg2: i32) -> (i32, i32) {
    %c0_i32 = arith.constant 0 : i32
    %c0_i32_0 = arith.constant 0 : i32
    return %c0_i32, %arg1 : i32, i32
  }
  func.func @transform_3(%arg0: i32, %arg1: i32, %arg2: i32) -> (i32, i32) {
    %c0_i32 = arith.constant 0 : i32
    return %arg0, %arg1 : i32, i32
  }
}

</mosaic_0001>

<bundles_post_ra>
// kernel: tpu_custom_call.1
= control target key start
LH: loop header
LB: loop body
LE: loop exit
PB: predicated region body
PF: predicated region fallthrough
CT: control target
= control target key end

     0   :  { %8 = vsyncpa [#allocation4], 0  ;;  %s3347_s0 = inlined_call_operand.vmem [shape: bf16[512,64], index: 0, kind: input, shape index: {}]   ;;  %s3348_s1 = inlined_call_operand.vmem [shape: bf16[64,256], index: 1, kind: input, shape index: {}]   ;;  %s3349_s2 = inlined_call_operand.vmem [shape: f32[1,256], index: 2, kind: input, shape index: {}]   ;;  %s3350_s3 = inlined_call_operand.hbm [shape: bf16[512,256], index: 3, kind: output, shape index: {}]  }
   0x1   :  { %10 = vsyncpa [#allocation4 + $0x1], 0  ;;  %s2448_s12 = smov 0   ;;  %s2450_s13 = smov 0  }
   0x2   :  { %s2452_s14 = smov 0   ;;  %s2454_s15 = smov 0  }
   0x3   :  { %s2456_s16 = smov 0   ;;  %s2458_s17 = smov 0  }
   0x4 LB: > { %s2000_s18 = sadd.s32 4294967295, %s2422_s17   ;;  %s2001_s19 = sadd.s32 4294967294, %s2422_s17   ;;  %s2422_s17 = sphi %s2458_s17, %s16_s17   ;;  %s2418_s16 = sphi %s2456_s16, %s3377_s16   ;;  %s2414_s15 = sphi %s2454_s15, %s3376_s15   ;;  %s2410_s14 = sphi %s2452_s14, %s3375_s14   ;;  %s2406_s13 = sphi %s2450_s13, %s3374_s13   ;;  %s2402_s12 = sphi %s2448_s12, %s3373_s12  }
   0x5   : > { %s35_s20 = sadd.s32 1, %s2418_s16  ;;  %s126_s21 = sadd.s32 1, %s2410_s14 }
   0x6   : > { %p37_p0 = scmp.ge.s32.totalorder %s35_s20, 2  ;;  %p136_p1 = scmp.ne.s32.totalorder %s2410_s14, %s2406_s13 }
   0x7   : > { %p137_p2 = scmp.eq.s32.totalorder %s2000_s18, 1  ;;  %p142_p3 = scmp.ne.s32.totalorder %s2406_s13, %s2402_s12 }
   0x8   : > { %s3379_s20 = smov (%p37_p0, %s35_s20), 0  ;;  %p143_p5 = scmp.eq.s32.totalorder %s2001_s19, 1 }
   0x9   : > { %p2488_p4 = por %p137_p2, %p136_p1  ;;  %s121_s23 = ssub.s32 %s2418_s16, %s3379_s20 }
   0xa   : > { %p2006_p6 = scmp.ge.s32.totalorder %s2422_s17, 1  ;;  %p124_p7 = scmp.eq.s32.totalorder %s121_s23, 0 }
   0xb   : > { %p2495_p8 = por %p143_p5, %p142_p3  ;;  %p196_p9 = scmp.lt.s32.totalorder %s2422_s17, 3 }
   0xc   : > { %s2501_s25 = scalar_select %p124_p7, %s2410_s14, %s126_s21  }
   0xd   : > { %p197_p10 = pnand %p2006_p6, %p196_p9 }
   0xf   : > { %200 = sbr.rel (%p197_p10) target bundleno = 452 (0x1c4), region = 32 }
  0x16   : > { %v2188_v0 = vld [vmem:[%s3348_s1 + $0x4] ss:$8 sps:$4 sm:$0xff]   ;;  %s2008_s28 = sshll.u32 %s2414_s15, 5  ;;  %v2190_v1 = vld [vmem:[%s3348_s1] ss:$8 sps:$4 sm:$0xff]   ;;  %v2424_v2 = vmov 0   ;;  %v997_v25 = vlaneseq }
  0x17   : > { %639 = vmatprep.mubr.bf16.mxu0 %v2424_v2  ;;  %719 = vmatprep.mubr.bf16.mxu1 %v2424_v2  ;;  %p238_p11 = scmp.lt.s32.totalorder %s2008_s28, 63  ;;  %v2191_v3 = vld [vmem:[%s3348_s1 + $0x14] ss:$8 sps:$4 sm:$0xff]   ;;  %v2193_v4 = vld [vmem:[%s3348_s1 + $0x10] ss:$8 sps:$4 sm:$0xff]   ;;  %vm558_vm0 = vcmask 523264  }
  0x18   : > { %607 = vmatprep.subr.bf16.mxu0 %v2188_v0  ;;  %2122 = vmatprep.subr.bf16.mxu1 %v2188_v0  ;;  %v2194_v5 = vld [vmem:[%s3348_s1 + $0x24] ss:$8 sps:$4 sm:$0xff]   ;;  %v2196_v6 = vld [vmem:[%s3348_s1 + $0x20] ss:$8 sps:$4 sm:$0xff]   ;;  %v2197_v7 = vld [vmem:[%s3348_s1 + $0x34] ss:$8 sps:$4 sm:$0xff]  }
  0x19   : > { %608 = vmatpush1.bf16.msra.mxu0 %v2190_v1  ;;  %2126 = vmatpush1.bf16.msra.mxu1 %v2190_v1  ;;  %s3381_s28 = smov (!%p238_p11, %s2008_s28), 63  ;;  %v2199_v8 = vld [vmem:[%s3348_s1 + $0x30] ss:$8 sps:$4 sm:$0xff]   ;;  %v998_v26 = vshrl.u32 %v997_v25, 7  ;;  %v995_v28 = vld [vmem:[%s3349_s2] sm:$0x3] }
  0x1a   : > { %609 = vmatprep.subr.bf16.mxu0 %v2191_v3  ;;  %2123 = vmatprep.subr.bf16.mxu1 %v2191_v3  ;;  %s2009_s10 = sshll.u32 %s3381_s28, 2  ;;  %s234_s5 = sand.u32 1, %s2406_s13  }
  0x1b   : > { %s2524_s19 = scalar_lea.vmem %s3347_s0, %s2009_s10  ;;  %v999_v27 = vsub.s32 0, %v998_v26  ;;  %v1003_v29 = vsub.s32 1, %v998_v26  ;;  %s2728_s6 = sshll.u32 %s234_s5, 8 }
  0x1c   : > { %v2200_v9 = vld [vmem:[%s2524_s19] sm:$0xff]   ;;  %v2202_v11 = vld [vmem:[%s2524_s19 + $0x8] sm:$0xff]   ;;  %v2204_v13 = vld [vmem:[%s2524_s19 + $0x10] sm:$0xff]   ;;  %s2749_s7 = scalar_lea.vmem [#allocation3], %s2728_s6  ;;  %s2121_s8 = sshll.u32 %s2414_s15, 12 }
  0x1d   : > { %610 = vmatpush1.bf16.msra.mxu0 %v2193_v4  ;;  %2127 = vmatpush1.bf16.msra.mxu1 %v2193_v4  ;;  %v2201_v10 = vld [vmem:[%s2524_s19 + $0x40] sm:$0xff]   ;;  %v2203_v12 = vld [vmem:[%s2524_s19 + $0x48] sm:$0xff]   ;;  %v2205_v14 = vld [vmem:[%s2524_s19 + $0x50] sm:$0xff]   ;;  %v2584_v30 = vrot.slane %v995_v28, %v999_v27  ;;  %v2586_v31 = vrot.slane %v995_v28, %v1003_v29  ;;  %s1888_s9 = sshll.u32 %s2749_s7, 4  ;;  %s3293_s18 = scalar_lea.hbm %s3350_s3, %s2121_s8  ;;  %s3295_s9 = int_to_ptr.vmem [resolvable:$true] %s1888_s9 }
  0x1e   : > { %611 = vmatprep.subr.bf16.mxu0 %v2194_v5  ;;  %2124 = vmatprep.subr.bf16.mxu1 %v2194_v5  ;;  %v2206_v15 = vld [vmem:[%s2524_s19 + $0x18] sm:$0xff]   ;;  %v2208_v17 = vld [vmem:[%s2524_s19 + $0x20] sm:$0xff]   ;;  %v2210_v19 = vld [vmem:[%s2524_s19 + $0x28] sm:$0xff]   ;;  %s2344_s15 = scalar_lea.vmem %s3295_s9, 4096  ;;  %s2425_s21 = smov [#allocation3]  }
  0x1f   : > { %v2207_v16 = vld [vmem:[%s2524_s19 + $0x58] sm:$0xff]   ;;  %v2209_v18 = vld [vmem:[%s2524_s19 + $0x60] sm:$0xff]   ;;  %v2211_v20 = vld [vmem:[%s2524_s19 + $0x68] sm:$0xff]   ;;  %p2345_p12 = scmp.ne.s32.totalorder %s3295_s9, %s2344_s15  ;;  %s2348_s23 = sshll.u32 %s2425_s21, 4  ;;  %s2349_s23 = int_to_ptr.vmem [resolvable:$false] %s2348_s23 }
  0x20   : > { %v2212_v21 = vld [vmem:[%s2524_s19 + $0x30] sm:$0xff]   ;;  %v2214_v23 = vld [vmem:[%s2524_s19 + $0x38] sm:$0xff]   ;;  %s2350_s26 = scalar_lea.vmem %s2349_s23, 8192  ;;  %p2351_p1 = scmp.lt.s32.totalorder %s3295_s9, %s2349_s23 }
  0x21   : > { %612 = vmatpush1.bf16.msra.mxu0 %v2196_v6  ;;  %2128 = vmatpush1.bf16.msra.mxu1 %v2196_v6  ;;  %v2213_v22 = vld [vmem:[%s2524_s19 + $0x70] sm:$0xff]   ;;  %v2215_v24 = vld [vmem:[%s2524_s19 + $0x78] sm:$0xff]   ;;  %s3301_s19 = scalar_lea.sflag [#allocation4], %s234_s5  ;;  %p2346_p13 = pnand %p2345_p12, %p2488_p4 }
  0x22   : > { %613 = vmatprep.subr.bf16.mxu0 %v2197_v7  ;;  %2125 = vmatprep.subr.bf16.mxu1 %v2197_v7  ;;  %p2352_p2 = scmp.lt.s32.totalorder %s2350_s26, %s2344_s15 }
  0x23   : > { %p2347_p0 = pneg %p2346_p13 }
  0x24   : > { %p2353_p3 = por %p2352_p2, %p2351_p1 }
  0x25   : > { %614 = vmatpush1.bf16.msra.mxu0 %v2199_v8  ;;  %2129 = vmatpush1.bf16.msra.mxu1 %v2199_v8 }
  0x26   : > { %p2354_p5 = pnand %p2353_p3, %p2347_p0 }
  0x28   : > { %2034 = vmatmul.mubr.msk.bf16.vlgmr.msra.gmra.mrb[0].mxu0 %vm558_vm0, %v2200_v9  ;;  %2042 = vmatmul.mubr.msk.bf16.vlgmr.msra.gmra.mrb[0].mxu1 %vm558_vm0, %v2201_v10 }
  0x29   : > { %649 = vmatprep.mubr.bf16.mxu0 %v2424_v2  ;;  %729 = vmatprep.mubr.bf16.mxu1 %v2424_v2 }
  0x30   : > { %2035 = vmatmul.mubr.msk.bf16.gmra.mrb[4].mxu0 %vm558_vm0, %v2202_v11  ;;  %2043 = vmatmul.mubr.msk.bf16.gmra.mrb[4].mxu1 %vm558_vm0, %v2203_v12 }
  0x31   : > { %659 = vmatprep.mubr.bf16.mxu0 %v2424_v2  ;;  %739 = vmatprep.mubr.bf16.mxu1 %v2424_v2 }
  0x38   : > { %2036 = vmatmul.mubr.msk.bf16.gmra.mrb[8].mxu0 %vm558_vm0, %v2204_v13  ;;  %2044 = vmatmul.mubr.msk.bf16.gmra.mrb[8].mxu1 %vm558_vm0, %v2205_v14 }
  0x39   : > { %669 = vmatprep.mubr.bf16.mxu0 %v2424_v2  ;;  %749 = vmatprep.mubr.bf16.mxu1 %v2424_v2 }
  0x40   : > { %2037 = vmatmul.mubr.msk.bf16.gmra.mrb[12].mxu0 %vm558_vm0, %v2206_v15  ;;  %2045 = vmatmul.mubr.msk.bf16.gmra.mrb[12].mxu1 %vm558_vm0, %v2207_v16 }
  0x41   : > { %679 = vmatprep.mubr.bf16.mxu0 %v2424_v2  ;;  %759 = vmatprep.mubr.bf16.mxu1 %v2424_v2 }
  0x48   : > { %2038 = vmatmul.mubr.msk.bf16.gmra.mrb[16].mxu0 %vm558_vm0, %v2208_v17  ;;  %2046 = vmatmul.mubr.msk.bf16.gmra.mrb[16].mxu1 %vm558_vm0, %v2209_v18 }
  0x49   : > { %689 = vmatprep.mubr.bf16.mxu0 %v2424_v2  ;;  %769 = vmatprep.mubr.bf16.mxu1 %v2424_v2 }
  0x50   : > { %2039 = vmatmul.mubr.msk.bf16.gmra.mrb[20].mxu0 %vm558_vm0, %v2210_v19  ;;  %2047 = vmatmul.mubr.msk.bf16.gmra.mrb[20].mxu1 %vm558_vm0, %v2211_v20 }
  0x51   : > { %699 = vmatprep.mubr.bf16.mxu0 %v2424_v2  ;;  %779 = vmatprep.mubr.bf16.mxu1 %v2424_v2 }
  0x58   : > { %2040 = vmatmul.mubr.msk.bf16.gmra.mrb[24].mxu0 %vm558_vm0, %v2212_v21  ;;  %2048 = vmatmul.mubr.msk.bf16.gmra.mrb[24].mxu1 %vm558_vm0, %v2213_v22 }
  0x59   : > { %709 = vmatprep.mubr.bf16.mxu0 %v2424_v2  ;;  %789 = vmatprep.mubr.bf16.mxu1 %v2424_v2 }
  0x60   : > { %2041 = vmatmul.mubr.msk.bf16.gmra.mrb[28].mxu0 %vm558_vm0, %v2214_v23  ;;  %2049 = vmatmul.mubr.msk.bf16.gmra.mrb[28].mxu1 %vm558_vm0, %v2215_v24 }
  0xfb   : > { %v641_v32 = vpop.f32.mrb[0].mxu0  ;;  %v721_v33 = vpop.f32.mrb[0].mxu1 }
  0xfc   : > { %v2589_v34 = vadd.f32 %v2584_v30, %v641_v32  ;;  %v2592_v35 = vadd.f32 %v2584_v30, %v721_v33  ;;  %v643_v36 = vpop.f32.mrb[1].mxu0  ;;  %v723_v37 = vpop.f32.mrb[1].mxu1 }
  0xfd   : > { %v2595_v38 = vadd.f32 %v2586_v31, %v643_v36  ;;  %v2598_v39 = vadd.f32 %v2586_v31, %v723_v37  ;;  %v645_v40 = vpop.f32.mrb[2].mxu0  ;;  %v725_v41 = vpop.f32.mrb[2].mxu1 }
  0xfe   : > { %v1071_v42 = vmul.f32 %v2589_v34, %v2589_v34  ;;  %v1103_v43 = vmul.f32 %v2592_v35, %v2592_v35  ;;  %v2605_v44 = vadd.f32 %v2584_v30, %v645_v40  ;;  %v2608_v45 = vadd.f32 %v2584_v30, %v725_v41  ;;  %v647_v46 = vpop.f32.mrb[3].mxu0  ;;  %v727_v47 = vpop.f32.mrb[3].mxu1 }
  0xff   : > { %v1072_v48 = vmul.f32 %v2595_v38, %v2595_v38  ;;  %v1104_v49 = vmul.f32 %v2598_v39, %v2598_v39  ;;  %v2615_v50 = vadd.f32 %v2586_v31, %v647_v46  ;;  %v2618_v51 = vadd.f32 %v2586_v31, %v727_v47 }
 0x100   : > { %v1135_v52 = vmul.f32 %v1071_v42, %v2589_v34  ;;  %v1167_v53 = vmul.f32 %v1103_v43, %v2592_v35  ;;  %v1073_v54 = vmul.f32 %v2605_v44, %v2605_v44  ;;  %v1105_v55 = vmul.f32 %v2608_v45, %v2608_v45 }
 0x101   : > { %v1136_v56 = vmul.f32 %v1072_v48, %v2595_v38  ;;  %v1168_v57 = vmul.f32 %v1104_v49, %v2598_v39  ;;  %v1074_v58 = vmul.f32 %v2615_v50, %v2615_v50  ;;  %v1106_v59 = vmul.f32 %v2618_v51, %v2618_v51 }
 0x102   : > { %v1199_v60 = vmul.f32 0.044715, %v1135_v52  ;;  %v1231_v61 = vmul.f32 0.044715, %v1167_v53  ;;  %v1137_v62 = vmul.f32 %v1073_v54, %v2605_v44  ;;  %v1169_v63 = vmul.f32 %v1105_v55, %v2608_v45 }
 0x103   : > { %v1200_v0 = vmul.f32 0.044715, %v1136_v56  ;;  %v1232_v1 = vmul.f32 0.044715, %v1168_v57  ;;  %v1138_v2 = vmul.f32 %v1074_v58, %v2615_v50  ;;  %v1170_v3 = vmul.f32 %v1106_v59, %v2618_v51  ;;  %v651_v4 = vpop.f32.mrb[4].mxu0  ;;  %v731_v5 = vpop.f32.mrb[4].mxu1 }
 0x104   : > { %v1263_v6 = vadd.f32 %v1199_v60, %v2589_v34  ;;  %v1295_v7 = vadd.f32 %v1231_v61, %v2592_v35  ;;  %v1201_v8 = vmul.f32 0.044715, %v1137_v62  ;;  %v1233_v9 = vmul.f32 0.044715, %v1169_v63  ;;  %v653_v10 = vpop.f32.mrb[5].mxu0  ;;  %v733_v11 = vpop.f32.mrb[5].mxu1 }
 0x105   : > { %v1264_v12 = vadd.f32 %v1200_v0, %v2595_v38  ;;  %v1296_v13 = vadd.f32 %v1232_v1, %v2598_v39  ;;  %v1202_v14 = vmul.f32 0.044715, %v1138_v2  ;;  %v1234_v15 = vmul.f32 0.044715, %v1170_v3  ;;  %v655_v16 = vpop.f32.mrb[6].mxu0  ;;  %v735_v17 = vpop.f32.mrb[6].mxu1 }
 0x106   : > { %v1327_v18 = vmul.f32 0.7978846, %v1263_v6  ;;  %v1359_v19 = vmul.f32 0.7978846, %v1295_v7  ;;  %v1265_v20 = vadd.f32 %v1201_v8, %v2605_v44  ;;  %v1297_v21 = vadd.f32 %v1233_v9, %v2608_v45  ;;  %v657_v22 = vpop.f32.mrb[7].mxu0  ;;  %v737_v23 = vpop.f32.mrb[7].mxu1 }
 0x107   : > { %v1328_v24 = vmul.f32 0.7978846, %v1264_v12  ;;  %v1360_v25 = vmul.f32 0.7978846, %v1296_v13  ;;  %v1266_v26 = vadd.f32 %v1202_v14, %v2615_v50  ;;  %v1298_v27 = vadd.f32 %v1234_v15, %v2618_v51 }
 0x108   : > { %2216 = vtanh.f32 %v1327_v18  ;;  %v1329_v28 = vmul.f32 0.7978846, %v1265_v20  ;;  %v1361_v29 = vmul.f32 0.7978846, %v1297_v21  ;;  %v2645_v32 = vadd.f32 %v2584_v30, %v651_v4 }
 0x109   : > { %2218 = vtanh.f32 %v1359_v19  ;;  %v1330_v33 = vmul.f32 0.7978846, %v1266_v26  ;;  %v1362_v36 = vmul.f32 0.7978846, %v1298_v27  ;;  %v2648_v37 = vadd.f32 %v2584_v30, %v731_v5 }
 0x10a   : > { %2220 = vtanh.f32 %v1328_v24  ;;  %v1075_v40 = vmul.f32 %v2645_v32, %v2645_v32  ;;  %v2653_v41 = vadd.f32 %v2586_v31, %v653_v10  ;;  %v2656_v42 = vadd.f32 %v2586_v31, %v733_v11 }
 0x10b   : > { %2222 = vtanh.f32 %v1360_v25  ;;  %v1107_v43 = vmul.f32 %v2648_v37, %v2648_v37  ;;  %v2661_v46 = vadd.f32 %v2584_v30, %v655_v16  ;;  %v2664_v47 = vadd.f32 %v2584_v30, %v735_v17  ;;  %v2666_v48 = vpop.f32.mrb[8].mxu0  ;;  %v2668_v49 = vpop.f32.mrb[8].mxu1 }
 0x10c   : > { %2224 = vtanh.f32 %v1329_v28  ;;  %v1139_v52 = vmul.f32 %v1075_v40, %v2645_v32  ;;  %v1076_v53 = vmul.f32 %v2653_v41, %v2653_v41  ;;  %v1108_v54 = vmul.f32 %v2656_v42, %v2656_v42  ;;  %v2675_v55 = vpop.f32.mrb[9].mxu0  ;;  %v2677_v56 = vpop.f32.mrb[9].mxu1 }
 0x10d   : > { %2226 = vtanh.f32 %v1361_v29  ;;  %v1171_v57 = vmul.f32 %v1107_v43, %v2648_v37  ;;  %v1077_v58 = vmul.f32 %v2661_v46, %v2661_v46  ;;  %v1109_v59 = vmul.f32 %v2664_v47, %v2664_v47  ;;  %v2684_v60 = vpop.f32.mrb[10].mxu0  ;;  %v2686_v61 = vpop.f32.mrb[10].mxu1 }
 0x10e   : > { %2228 = vtanh.f32 %v1330_v33  ;;  %v1203_v62 = vmul.f32 0.044715, %v1139_v52  ;;  %v1140_v63 = vmul.f32 %v1076_v53, %v2653_v41  ;;  %v1172_v0 = vmul.f32 %v1108_v54, %v2656_v42  ;;  %v2690_v1 = vpop.f32.mrb[11].mxu0  ;;  %v2692_v2 = vpop.f32.mrb[11].mxu1 }
 0x10f   : > { %2230 = vtanh.f32 %v1362_v36  ;;  %v1235_v3 = vmul.f32 0.044715, %v1171_v57  ;;  %v1141_v4 = vmul.f32 %v1077_v58, %v2661_v46  ;;  %v1173_v5 = vmul.f32 %v1109_v59, %v2664_v47 }
 0x110   : > { %v1267_v6 = vadd.f32 %v1203_v62, %v2645_v32  ;;  %v1204_v7 = vmul.f32 0.044715, %v1140_v63  ;;  %v1236_v8 = vmul.f32 0.044715, %v1172_v0  ;;  %v2698_v9 = vadd.f32 %v2586_v31, %v657_v22 }
 0x111   : > { %v1299_v10 = vadd.f32 %v1235_v3, %v2648_v37  ;;  %v1205_v11 = vmul.f32 0.044715, %v1141_v4  ;;  %v1237_v12 = vmul.f32 0.044715, %v1173_v5  ;;  %v2702_v13 = vadd.f32 %v2586_v31, %v737_v23 }
 0x112   : > { %v2217_v14 = vpop.eup %2216  ;;  %v1331_v15 = vmul.f32 0.7978846, %v1267_v6  ;;  %v1268_v16 = vadd.f32 %v1204_v7, %v2653_v41  ;;  %v1300_v17 = vadd.f32 %v1236_v8, %v2656_v42  ;;  %v1078_v18 = vmul.f32 %v2698_v9, %v2698_v9 }
 0x113   : > { %v2219_v19 = vpop.eup %2218  ;;  %v1455_v20 = vadd.f32 1.0, %v2217_v14  ;;  %v1363_v21 = vmul.f32 0.7978846, %v1299_v10  ;;  %v1269_v22 = vadd.f32 %v1205_v11, %v2661_v46  ;;  %v1301_v24 = vadd.f32 %v1237_v12, %v2664_v47  ;;  %v2711_v25 = vpop.f32.mrb[12].mxu0 }
 0x114   : > { %v2713_v23 = vpop.f32.mrb[12].mxu1  ;;  %v2221_v26 = vpop.eup %2220  ;;  %v1487_v27 = vadd.f32 1.0, %v2219_v19  ;;  %2232 = vtanh.f32 %v1331_v15  ;;  %v1332_v28 = vmul.f32 0.7978846, %v1268_v16  ;;  %v1364_v29 = vmul.f32 0.7978846, %v1300_v17 }
 0x115   : > { %v2715_v33 = vpop.f32.mrb[13].mxu0  ;;  %v2223_v36 = vpop.eup %2222  ;;  %v1519_v40 = vmul.f32 0.5, %v1455_v20  ;;  %v1456_v43 = vadd.f32 1.0, %v2221_v26  ;;  %2234 = vtanh.f32 %v1363_v21  ;;  %v1333_v52 = vmul.f32 0.7978846, %v1269_v22 }
 0x116   : > { %v2717_v53 = vpop.f32.mrb[13].mxu1  ;;  %v2719_v54 = vpop.f32.mrb[14].mxu0  ;;  %v1551_v58 = vmul.f32 0.5, %v1487_v27  ;;  %v1488_v59 = vadd.f32 1.0, %v2223_v36  ;;  %2236 = vtanh.f32 %v1332_v28  ;;  %v1365_v62 = vmul.f32 0.7978846, %v1301_v24 }
 0x117   : > { %v2225_v57 = vpop.eup %2224  ;;  %v2721_v63 = vpop.f32.mrb[14].mxu1  ;;  %v1583_v4 = vmul.f32 %v1519_v40, %v2589_v34  ;;  %v1520_v5 = vmul.f32 0.5, %v1456_v43  ;;  %2238 = vtanh.f32 %v1364_v29  ;;  %v1142_v21 = vmul.f32 %v1078_v18, %v2698_v9 }
 0x118   : > { %v2723_v0 = vpop.f32.mrb[15].mxu0  ;;  %v2227_v3 = vpop.eup %2226  ;;  %v1457_v6 = vadd.f32 1.0, %v2225_v57  ;;  %v1615_v10 = vmul.f32 %v1551_v58, %v2592_v35  ;;  %v1552_v11 = vmul.f32 0.5, %v1488_v59  ;;  %2240 = vtanh.f32 %v1333_v52 }
 0x119   : > { %v2730_v7 = vpop.f32.mrb[15].mxu1  ;;  %v2229_v8 = vpop.eup %2228  ;;  %v1489_v12 = vadd.f32 1.0, %v2227_v3  ;;  %v1584_v15 = vmul.f32 %v1520_v5, %v2595_v38  ;;  %2242 = vtanh.f32 %v1365_v62  ;;  %v1110_v26 = vmul.f32 %v2702_v13, %v2702_v13 }
 0x11a   : > { %v2231_v14 = vpop.eup %2230  ;;  %v1521_v16 = vmul.f32 0.5, %v1457_v6  ;;  %v1458_v17 = vadd.f32 1.0, %v2229_v8  ;;  %v1616_v34 = vmul.f32 %v1552_v11, %v2598_v39  ;;  %v1206_v36 = vmul.f32 0.044715, %v1142_v21 }
 0x11b   : > { %v1553_v19 = vmul.f32 0.5, %v1489_v12  ;;  %v1490_v20 = vadd.f32 1.0, %v2231_v14  ;;  %v2088_v22 = vpack.c.bf16 %v1584_v15, %v1583_v4  ;;  %v2739_v27 = vpop.f32.mrb[16].mxu0  ;;  %v2741_v38 = vpop.f32.mrb[16].mxu1  ;;  %v1174_v18 = vmul.f32 %v1110_v26, %v2702_v13 }
 0x11c   : > { %v1585_v24 = vmul.f32 %v1521_v16, %v2605_v44  ;;  %v1522_v35 = vmul.f32 0.5, %v1458_v17  ;;  %v2104_v28 = vpack.c.bf16 %v1616_v34, %v1615_v10  ;;  %v2744_v40 = vpop.f32.mrb[17].mxu0  ;;  %v2746_v43 = vpop.f32.mrb[17].mxu1  ;;  %v2756_v52 = vadd.f32 %v2584_v30, %v2666_v48 }
 0x11d   : > { %v1617_v29 = vmul.f32 %v1553_v19, %v2608_v45  ;;  %v1554_v39 = vmul.f32 0.5, %v1490_v20  ;;  %1839 = vst [vmem:[%s2749_s7] sm:$0xff] %v2088_v22  ;;  %v2760_v45 = vadd.f32 %v2584_v30, %v2668_v49  ;;  %v2762_v57 = vpop.f32.mrb[18].mxu0  ;;  %v2764_v58 = vpop.f32.mrb[18].mxu1  ;;  %v2771_v3 = vadd.f32 %v2586_v31, %v2675_v55 }
 0x11e   : > { %v1586_v44 = vmul.f32 %v1522_v35, %v2615_v50  ;;  %v2233_v59 = vpop.eup %2232  ;;  %1855 = vst [vmem:[%s2749_s7 + $0x80] sm:$0xff] %v2104_v28  ;;  %v1270_v50 = vadd.f32 %v1206_v36, %v2698_v9  ;;  %v2775_v48 = vadd.f32 %v2586_v31, %v2677_v56  ;;  %v2777_v49 = vpop.f32.mrb[19].mxu0  ;;  %v1079_v10 = vmul.f32 %v2756_v52, %v2756_v52 }
 0x11f   : > { %v1618_v62 = vmul.f32 %v1554_v39, %v2618_v51  ;;  %v2779_v4 = vpop.f32.mrb[19].mxu1  ;;  %v2235_v5 = vpop.eup %2234  ;;  %v1459_v8 = vadd.f32 1.0, %v2233_v59  ;;  %v1238_v51 = vmul.f32 0.044715, %v1174_v18  ;;  %v1111_v56 = vmul.f32 %v2760_v45, %v2760_v45 }
 0x120   : > { %v2089_v6 = vpack.c.bf16 %v1586_v44, %v1585_v24  ;;  %v2237_v11 = vpop.eup %2236  ;;  %v1491_v55 = vadd.f32 1.0, %v2235_v5  ;;  %v1334_v14 = vmul.f32 0.7978846, %v1270_v50  ;;  %v1143_v19 = vmul.f32 %v1079_v10, %v2756_v52 }
 0x121   : > { %v2105_v12 = vpack.c.bf16 %v1618_v62, %v1617_v29  ;;  %v2239_v15 = vpop.eup %2238  ;;  %v1523_v16 = vmul.f32 0.5, %v1459_v8  ;;  %v1460_v17 = vadd.f32 1.0, %v2237_v11  ;;  %v1302_v34 = vadd.f32 %v1238_v51, %v2702_v13 }
 0x122   : > { %1840 = vst [vmem:[%s2749_s7 + $0x8] sm:$0xff] %v2089_v6  ;;  %v2241_v20 = vpop.eup %2240  ;;  %v1555_v21 = vmul.f32 0.5, %v1491_v55  ;;  %v1492_v22 = vadd.f32 1.0, %v2239_v15  ;;  %2244 = vtanh.f32 %v1334_v14  ;;  %v1175_v24 = vmul.f32 %v1111_v56, %v2760_v45 }
 0x123   : > { %1856 = vst [vmem:[%s2749_s7 + $0x88] sm:$0xff] %v2105_v12  ;;  %v2243_v35 = vpop.eup %2242  ;;  %v1587_v26 = vmul.f32 %v1523_v16, %v2645_v32  ;;  %v1524_v28 = vmul.f32 0.5, %v1460_v17  ;;  %v1461_v29 = vadd.f32 1.0, %v2241_v20  ;;  %v1366_v39 = vmul.f32 0.7978846, %v1302_v34  ;;  %v2791_v36 = vpop.f32.mrb[20].mxu0 }
 0x124   : > { %v2793_v44 = vpop.f32.mrb[20].mxu1  ;;  %v1619_v18 = vmul.f32 %v1555_v21, %v2648_v37  ;;  %v1556_v59 = vmul.f32 0.5, %v1492_v22  ;;  %v1493_v62 = vadd.f32 1.0, %v2243_v35  ;;  %v1207_v50 = vmul.f32 0.044715, %v1143_v19  ;;  %v2796_v5 = vpop.f32.mrb[21].mxu0 }
 0x125   : > { %v2798_v6 = vpop.f32.mrb[21].mxu1  ;;  %v1588_v8 = vmul.f32 %v1524_v28, %v2653_v41  ;;  %v1525_v51 = vmul.f32 0.5, %v1461_v29  ;;  %2246 = vtanh.f32 %v1366_v39  ;;  %v1239_v32 = vmul.f32 0.044715, %v1175_v24  ;;  %v2801_v10 = vpop.f32.mrb[22].mxu0 }
 0x126   : > { %v2803_v11 = vpop.f32.mrb[22].mxu1  ;;  %v1620_v12 = vmul.f32 %v1556_v59, %v2656_v42  ;;  %v1557_v37 = vmul.f32 0.5, %v1493_v62  ;;  %v1271_v55 = vadd.f32 %v1207_v50, %v2756_v52  ;;  %v1080_v14 = vmul.f32 %v2771_v3, %v2771_v3  ;;  %v2809_v56 = vpop.f32.mrb[23].mxu0 }
 0x127   : > { %v2811_v41 = vpop.f32.mrb[23].mxu1  ;;  %v2090_v15 = vpack.c.bf16 %v1588_v8, %v1587_v26  ;;  %v2814_v16 = vmul.f32 %v1525_v51, %v2661_v46  ;;  %v1303_v17 = vadd.f32 %v1239_v32, %v2760_v45  ;;  %v1112_v42 = vmul.f32 %v2775_v48, %v2775_v48 }
 0x128   : > { %v2106_v34 = vpack.c.bf16 %v1620_v12, %v1619_v18  ;;  %v2820_v19 = vmul.f32 %v1557_v37, %v2664_v47  ;;  %v1335_v20 = vmul.f32 0.7978846, %v1271_v55  ;;  %v1144_v21 = vmul.f32 %v1080_v14, %v2771_v3 }
 0x129   : > { %1841 = vst [vmem:[%s2749_s7 + $0x10] sm:$0xff] %v2090_v15  ;;  %v1367_v22 = vmul.f32 0.7978846, %v1303_v17  ;;  %v1176_v24 = vmul.f32 %v1112_v42, %v2775_v48  ;;  %v2827_v46 = vadd.f32 %v2584_v30, %v2684_v60  ;;  %v2831_v35 = vadd.f32 %v2584_v30, %v2686_v61 }
 0x12a   : > { %1857 = vst [vmem:[%s2749_s7 + $0x90] sm:$0xff] %v2106_v34  ;;  %2248 = vtanh.f32 %v1335_v20  ;;  %v1208_v26 = vmul.f32 0.044715, %v1144_v21  ;;  %v2836_v47 = vadd.f32 %v2586_v31, %v2690_v1  ;;  %v2840_v28 = vadd.f32 %v2586_v31, %v2692_v2 }
 0x12b   : > { %2250 = vtanh.f32 %v1367_v22  ;;  %v1240_v29 = vmul.f32 0.044715, %v1176_v24  ;;  %v1081_v60 = vmul.f32 %v2827_v46, %v2827_v46  ;;  %v1113_v61 = vmul.f32 %v2831_v35, %v2831_v35  ;;  %v2846_v39 = vpop.f32.mrb[24].mxu0  ;;  %v2848_v18 = vpop.f32.mrb[24].mxu1 }
 0x12c   : > { %v2245_v59 = vpop.eup %2244  ;;  %v1272_v1 = vadd.f32 %v1208_v26, %v2771_v3  ;;  %v1082_v62 = vmul.f32 %v2836_v47, %v2836_v47  ;;  %v1114_v2 = vmul.f32 %v2840_v28, %v2840_v28  ;;  %v2857_v50 = vadd.f32 %v2584_v30, %v2711_v25  ;;  %v2859_v8 = vpop.f32.mrb[25].mxu0 }
 0x12d   : > { %v2861_v51 = vpop.f32.mrb[25].mxu1  ;;  %v1462_v32 = vadd.f32 1.0, %v2245_v59  ;;  %v1304_v12 = vadd.f32 %v1240_v29, %v2775_v48  ;;  %v1145_v37 = vmul.f32 %v1081_v60, %v2827_v46  ;;  %v1177_v55 = vmul.f32 %v1113_v61, %v2831_v35  ;;  %v2866_v14 = vpop.f32.mrb[26].mxu0 }
 0x12e   : > { %v2868_v15 = vpop.f32.mrb[26].mxu1  ;;  %v1336_v17 = vmul.f32 0.7978846, %v1272_v1  ;;  %v1146_v42 = vmul.f32 %v1082_v62, %v2836_v47  ;;  %v1178_v25 = vmul.f32 %v1114_v2, %v2840_v28  ;;  %v1083_v34 = vmul.f32 %v2857_v50, %v2857_v50  ;;  %v2874_v20 = vpop.f32.mrb[27].mxu0 }
 0x12f   : > { %3353 = vst [vmem:[#allocation6_spill] sm:$0xff] %v2868_v15  ;;  %3354 = vst [vmem:[#allocation7_spill] sm:$0xff] %v2874_v20  ;;  %v2876_v21 = vpop.f32.mrb[27].mxu1  ;;  %v2247_v22 = vpop.eup %2246  ;;  %v1526_v24 = vmul.f32 0.5, %v1462_v32  ;;  %v1368_v26 = vmul.f32 0.7978846, %v1304_v12  ;;  %v2880_v60 = vadd.f32 %v2584_v30, %v2713_v23 }
 0x130   : > { %v1209_v29 = vmul.f32 0.044715, %v1145_v37  ;;  %v1494_v61 = vadd.f32 1.0, %v2247_v22  ;;  %2252 = vtanh.f32 %v1336_v17  ;;  %v1241_v59 = vmul.f32 0.044715, %v1177_v55 }
 0x131   : > { %v1210_v1 = vmul.f32 0.044715, %v1146_v42  ;;  %v1590_v62 = vmul.f32 %v1526_v24, %v2698_v9  ;;  %2254 = vtanh.f32 %v1368_v26  ;;  %v1242_v20 = vmul.f32 0.044715, %v1178_v25 }
 0x132   : > { %v1273_v2 = vadd.f32 %v1209_v29, %v2827_v46  ;;  %v1558_v15 = vmul.f32 0.5, %v1494_v61  ;;  %v1305_v32 = vadd.f32 %v1241_v59, %v2831_v35  ;;  %v1147_v37 = vmul.f32 %v1083_v34, %v2857_v50 }
 0x133   : > { %v1274_v12 = vadd.f32 %v1210_v1, %v2836_v47  ;;  %v2091_v23 = vpack.c.bf16 %v1590_v62, %v2814_v16  ;;  %v1306_v55 = vadd.f32 %v1242_v20, %v2840_v28  ;;  %v1115_v9 = vmul.f32 %v2880_v60, %v2880_v60  ;;  %v2891_v17 = vpop.f32.mrb[28].mxu0  ;;  %v2893_v42 = vpop.f32.mrb[28].mxu1 }
 0x134   : > { %v1337_v22 = vmul.f32 0.7978846, %v1273_v2  ;;  %3355 = vst [vmem:[#allocation8_spill] sm:$0xff] %v2891_v17  ;;  %3356 = vst [vmem:[#allocation9_spill] sm:$0xff] %v2893_v42  ;;  %v2249_v25 = vpop.eup %2248  ;;  %v1622_v24 = vmul.f32 %v1558_v15, %v2702_v13  ;;  %v1369_v26 = vmul.f32 0.7978846, %v1305_v32 }
 0x135   : > { %v1338_v29 = vmul.f32 0.7978846, %v1274_v12  ;;  %v1211_v61 = vmul.f32 0.044715, %v1147_v37  ;;  %v2251_v59 = vpop.eup %2250  ;;  %1842 = vst [vmem:[%s2749_s7 + $0x18] sm:$0xff] %v2091_v23  ;;  %v1463_v34 = vadd.f32 1.0, %v2249_v25  ;;  %v1179_v20 = vmul.f32 %v1115_v9, %v2880_v60 }
 0x136   : > { %2256 = vtanh.f32 %v1337_v22  ;;  %v1370_v16 = vmul.f32 0.7978846, %v1306_v55  ;;  %v2898_v1 = vpop.f32.mrb[29].mxu0  ;;  %v2900_v62 = vpop.f32.mrb[29].mxu1  ;;  %v2107_v2 = vpack.c.bf16 %v1622_v24, %v2820_v19  ;;  %v1495_v42 = vadd.f32 1.0, %v2251_v59 }
 0x137   : > { %3357 = vst [vmem:[#allocation10_spill] sm:$0xff] %v2898_v1  ;;  %3358 = vst [vmem:[#allocation11_spill] sm:$0xff] %v2900_v62  ;;  %2258 = vtanh.f32 %v1369_v26  ;;  %v1275_v13 = vadd.f32 %v1211_v61, %v2857_v50  ;;  %v2904_v15 = vpop.f32.mrb[30].mxu0  ;;  %v2906_v32 = vpop.f32.mrb[30].mxu1  ;;  %v1527_v12 = vmul.f32 0.5, %v1463_v34  ;;  %v2910_v23 = vadd.f32 %v2586_v31, %v2715_v33 }
 0x138   : > { %3359 = vst [vmem:[#allocation12_spill] sm:$0xff] %v2904_v15  ;;  %3360 = vst [vmem:[#allocation13_spill] sm:$0xff] %v2906_v32  ;;  %2260 = vtanh.f32 %v1338_v29  ;;  %v1243_v37 = vmul.f32 0.044715, %v1179_v20  ;;  %v2912_v22 = vpop.f32.mrb[31].mxu0  ;;  %v2914_v55 = vpop.f32.mrb[31].mxu1  ;;  %v2919_v25 = vadd.f32 %v2586_v31, %v2717_v53  ;;  %v2927_v29 = vadd.f32 %v2584_v30, %v2719_v54 }
 0x139   : > { %3361 = vst [vmem:[#allocation14_spill] sm:$0xff] %v2912_v22  ;;  %3362 = vst [vmem:[#allocation15_spill] sm:$0xff] %v2914_v55  ;;  %v1559_v19 = vmul.f32 0.5, %v1495_v42  ;;  %2262 = vtanh.f32 %v1370_v16  ;;  %v1339_v9 = vmul.f32 0.7978846, %v1275_v13  ;;  %v1591_v24 = vmul.f32 %v1527_v12, %v2756_v52 }
 0x13a   : > { %1858 = vst [vmem:[%s2749_s7 + $0x98] sm:$0xff] %v2107_v2  ;;  %v1307_v26 = vadd.f32 %v1243_v37, %v2880_v60  ;;  %v1084_v33 = vmul.f32 %v2910_v23, %v2910_v23  ;;  %v2253_v61 = vpop.eup %2252  ;;  %v1116_v59 = vmul.f32 %v2919_v25, %v2919_v25  ;;  %v2934_v53 = vadd.f32 %v2584_v30, %v2721_v63 }
 0x13b   : > { %v1623_v42 = vmul.f32 %v1559_v19, %v2760_v45  ;;  %2264 = vtanh.f32 %v1339_v9  ;;  %v2255_v52 = vpop.eup %2254  ;;  %v1464_v34 = vadd.f32 1.0, %v2253_v61  ;;  %v1085_v54 = vmul.f32 %v2927_v29, %v2927_v29 }
 0x13c   : > { %v1371_v16 = vmul.f32 0.7978846, %v1307_v26  ;;  %v1148_v20 = vmul.f32 %v1084_v33, %v2910_v23  ;;  %v1496_v2 = vadd.f32 1.0, %v2255_v52  ;;  %v1180_v13 = vmul.f32 %v1116_v59, %v2919_v25 }
 0x13d   : > { %v1117_v45 = vmul.f32 %v2934_v53, %v2934_v53  ;;  %v2944_v12 = vadd.f32 %v2586_v31, %v2723_v0  ;;  %v1528_v63 = vmul.f32 0.5, %v1464_v34  ;;  %v1149_v19 = vmul.f32 %v1085_v54, %v2927_v29 }
 0x13e   : > { %2266 = vtanh.f32 %v1371_v16  ;;  %v1212_v37 = vmul.f32 0.044715, %v1148_v20  ;;  %v1560_v9 = vmul.f32 0.5, %v1496_v2  ;;  %v1244_v26 = vmul.f32 0.044715, %v1180_v13 }
 0x13f   : > { %v1181_v33 = vmul.f32 %v1117_v45, %v2934_v53  ;;  %v1086_v61 = vmul.f32 %v2944_v12, %v2944_v12  ;;  %v1592_v52 = vmul.f32 %v1528_v63, %v2771_v3  ;;  %v1213_v22 = vmul.f32 0.044715, %v1149_v19 }
 0x140   : > { %v2257_v59 = vpop.eup %2256  ;;  %v1276_v55 = vadd.f32 %v1212_v37, %v2910_v23  ;;  %v2954_v0 = vadd.f32 %v2586_v31, %v2730_v7  ;;  %v1624_v16 = vmul.f32 %v1560_v9, %v2775_v48  ;;  %v1308_v54 = vadd.f32 %v1244_v26, %v2919_v25 }
 0x141   : > { %v2259_v34 = vpop.eup %2258  ;;  %v1465_v20 = vadd.f32 1.0, %v2257_v59  ;;  %v1245_v2 = vmul.f32 0.044715, %v1181_v33  ;;  %v2092_v45 = vpack.c.bf16 %v1592_v52, %v1591_v24  ;;  %v1277_v63 = vadd.f32 %v1213_v22, %v2927_v29 }
 0x142   : > { %v2261_v13 = vpop.eup %2260  ;;  %v1497_v32 = vadd.f32 1.0, %v2259_v34  ;;  %v1340_v3 = vmul.f32 0.7978846, %v1276_v55  ;;  %v2108_v19 = vpack.c.bf16 %v1624_v16, %v1623_v42  ;;  %v1372_v62 = vmul.f32 0.7978846, %v1308_v54 }
 0x143   : > { %v2263_v37 = vpop.eup %2262  ;;  %v1529_v15 = vmul.f32 0.5, %v1465_v20  ;;  %v1466_v7 = vadd.f32 1.0, %v2261_v13  ;;  %1843 = vst [vmem:[%s2749_s7 + $0x20] sm:$0xff] %v2092_v45  ;;  %v1341_v48 = vmul.f32 0.7978846, %v1277_v63  ;;  %v1309_v55 = vadd.f32 %v1245_v2, %v2934_v53 }
 0x144   : > { %v1561_v1 = vmul.f32 0.5, %v1497_v32  ;;  %v1498_v17 = vadd.f32 1.0, %v2263_v37  ;;  %2268 = vtanh.f32 %v1340_v3  ;;  %1859 = vst [vmem:[%s2749_s7 + $0xa0] sm:$0xff] %v2108_v19  ;;  %v1150_v32 = vmul.f32 %v1086_v61, %v2944_v12 }
 0x145   : > { %v2265_v9 = vpop.eup %2264  ;;  %v1593_v26 = vmul.f32 %v1529_v15, %v2827_v46  ;;  %v1530_v33 = vmul.f32 0.5, %v1466_v7  ;;  %2270 = vtanh.f32 %v1372_v62  ;;  %v1373_v52 = vmul.f32 0.7978846, %v1309_v55 }
 0x146   : > { %v1625_v22 = vmul.f32 %v1561_v1, %v2831_v35  ;;  %v1562_v24 = vmul.f32 0.5, %v1498_v17  ;;  %v1467_v42 = vadd.f32 1.0, %v2265_v9  ;;  %2272 = vtanh.f32 %v1341_v48 }
 0x147   : > { %v1594_v59 = vmul.f32 %v1530_v33, %v2836_v47  ;;  %v1118_v34 = vmul.f32 %v2954_v0, %v2954_v0  ;;  %v2971_v35 = vadd.f32 %v2584_v30, %v2739_v27  ;;  %v2975_v17 = vadd.f32 %v2584_v30, %v2741_v38 }
 0x148   : > { %v2267_v16 = vpop.eup %2266  ;;  %v1626_v46 = vmul.f32 %v1562_v24, %v2840_v28  ;;  %v1531_v62 = vmul.f32 0.5, %v1467_v42  ;;  %2274 = vtanh.f32 %v1373_v52  ;;  %v1214_v15 = vmul.f32 0.044715, %v1150_v32 }
 0x149   : > { %v2093_v47 = vpack.c.bf16 %v1594_v59, %v1593_v26  ;;  %v1499_v1 = vadd.f32 1.0, %v2267_v16  ;;  %v1182_v54 = vmul.f32 %v1118_v34, %v2954_v0  ;;  %v1087_v28 = vmul.f32 %v2971_v35, %v2971_v35 }
 0x14a   : > { %v2109_v61 = vpack.c.bf16 %v1626_v46, %v1625_v22  ;;  %v1595_v20 = vmul.f32 %v1531_v62, %v2857_v50  ;;  %v1278_v27 = vadd.f32 %v1214_v15, %v2944_v12  ;;  %v1119_v38 = vmul.f32 %v2975_v17, %v2975_v17 }
 0x14b   : > { %1844 = vst [vmem:[%s2749_s7 + $0x28] sm:$0xff] %v2093_v47  ;;  %v1563_v2 = vmul.f32 0.5, %v1499_v1  ;;  %v2987_v13 = vadd.f32 %v2586_v31, %v2744_v40  ;;  %v1246_v45 = vmul.f32 0.044715, %v1182_v54  ;;  %v1151_v50 = vmul.f32 %v1087_v28, %v2971_v35 }
 0x14c   : > { %1860 = vst [vmem:[%s2749_s7 + $0xa8] sm:$0xff] %v2109_v61  ;;  %v2993_v3 = vadd.f32 %v2586_v31, %v2746_v43  ;;  %v2997_v63 = vadd.f32 %v2584_v30, %v2762_v57  ;;  %v1342_v19 = vmul.f32 0.7978846, %v1278_v27  ;;  %v1183_v7 = vmul.f32 %v1119_v38, %v2975_v17 }
 0x14d   : > { %v1627_v37 = vmul.f32 %v1563_v2, %v2880_v60  ;;  %v1088_v40 = vmul.f32 %v2987_v13, %v2987_v13  ;;  %v1310_v9 = vadd.f32 %v1246_v45, %v2954_v0  ;;  %v1215_v26 = vmul.f32 0.044715, %v1151_v50 }
 0x14e   : > { %v2269_v48 = vpop.eup %2268  ;;  %v1120_v43 = vmul.f32 %v2993_v3, %v2993_v3  ;;  %v1089_v33 = vmul.f32 %v2997_v63, %v2997_v63  ;;  %2276 = vtanh.f32 %v1342_v19  ;;  %v1247_v60 = vmul.f32 0.044715, %v1183_v7 }
 0x14f   : > { %v2271_v57 = vpop.eup %2270  ;;  %v1468_v55 = vadd.f32 1.0, %v2269_v48  ;;  %v1152_v22 = vmul.f32 %v1088_v40, %v2987_v13  ;;  %v1374_v59 = vmul.f32 0.7978846, %v1310_v9  ;;  %v1279_v52 = vadd.f32 %v1215_v26, %v2971_v35 }
 0x150   : > { %v2273_v24 = vpop.eup %2272  ;;  %v1500_v42 = vadd.f32 1.0, %v2271_v57  ;;  %v1184_v32 = vmul.f32 %v1120_v43, %v2993_v3  ;;  %v1311_v46 = vadd.f32 %v1247_v60, %v2975_v17  ;;  %v1153_v26 = vmul.f32 %v1089_v33, %v2997_v63 }
 0x151   : > { %v1532_v34 = vmul.f32 0.5, %v1468_v55  ;;  %v1469_v16 = vadd.f32 1.0, %v2273_v24  ;;  %v1216_v62 = vmul.f32 0.044715, %v1152_v22  ;;  %2278 = vtanh.f32 %v1374_v59 }
 0x152   : > { %v1564_v47 = vmul.f32 0.5, %v1500_v42  ;;  %v1343_v1 = vmul.f32 0.7978846, %v1279_v52  ;;  %v1248_v15 = vmul.f32 0.044715, %v1184_v32  ;;  %v2275_v61 = vpop.eup %2274  ;;  %v3025_v43 = vadd.f32 %v2586_v31, %v2777_v49 }
 0x153   : > { %v1596_v54 = vmul.f32 %v1532_v34, %v2910_v23  ;;  %v1533_v28 = vmul.f32 0.5, %v1469_v16  ;;  %v1375_v2 = vmul.f32 0.7978846, %v1311_v46  ;;  %v1280_v27 = vadd.f32 %v1216_v62, %v2987_v13 }
 0x154   : > { %v1628_v38 = vmul.f32 %v1564_v47, %v2919_v25  ;;  %v1501_v45 = vadd.f32 1.0, %v2275_v61  ;;  %2280 = vtanh.f32 %v1343_v1  ;;  %v1312_v50 = vadd.f32 %v1248_v15, %v2993_v3 }
 0x155   : > { %v2094_v19 = vpack.c.bf16 %v1596_v54, %v1595_v20  ;;  %v1597_v7 = vmul.f32 %v1533_v28, %v2927_v29  ;;  %2282 = vtanh.f32 %v1375_v2  ;;  %v1344_v40 = vmul.f32 0.7978846, %v1280_v27 }
 0x156   : > { %v2110_v48 = vpack.c.bf16 %v1628_v38, %v1627_v37  ;;  %v1565_v9 = vmul.f32 0.5, %v1501_v45  ;;  %v1376_v23 = vmul.f32 0.7978846, %v1312_v50  ;;  %v3021_v25 = vadd.f32 %v2584_v30, %v2764_v58 }
 0x157   : > { %1845 = vst [vmem:[%s2749_s7 + $0x30] sm:$0xff] %v2094_v19  ;;  %2284 = vtanh.f32 %v1344_v40  ;;  %v3029_v29 = vadd.f32 %v2586_v31, %v2779_v4  ;;  %v1217_v37 = vmul.f32 0.044715, %v1153_v26  ;;  %v3035_v33 = vadd.f32 %v2584_v30, %v2791_v36 }
 0x158   : > { %1861 = vst [vmem:[%s2749_s7 + $0xb0] sm:$0xff] %v2110_v48  ;;  %v1629_v20 = vmul.f32 %v1565_v9, %v2934_v53  ;;  %2286 = vtanh.f32 %v1376_v23  ;;  %v2277_v57 = vpop.eup %2276  ;;  %v1121_v58 = vmul.f32 %v3021_v25, %v3021_v25  ;;  %v1090_v49 = vmul.f32 %v3025_v43, %v3025_v43 }
 0x159   : > { %v1122_v4 = vmul.f32 %v3029_v29, %v3029_v29  ;;  %v3045_v55 = vadd.f32 %v2584_v30, %v2793_v44  ;;  %v1470_v53 = vadd.f32 1.0, %v2277_v57  ;;  %v1281_v60 = vadd.f32 %v1217_v37, %v2997_v63 }
 0x15a   : > { %v1091_v36 = vmul.f32 %v3035_v33, %v3035_v33  ;;  %v3052_v22 = vadd.f32 %v2586_v31, %v2796_v5  ;;  %v1185_v24 = vmul.f32 %v1121_v58, %v3021_v25  ;;  %v1154_v42 = vmul.f32 %v1090_v49, %v3025_v43 }
 0x15b   : > { %v1186_v59 = vmul.f32 %v1122_v4, %v3029_v29  ;;  %v1123_v44 = vmul.f32 %v3045_v55, %v3045_v55  ;;  %v2279_v52 = vpop.eup %2278  ;;  %v1534_v32 = vmul.f32 0.5, %v1470_v53  ;;  %v1345_v34 = vmul.f32 0.7978846, %v1281_v60 }
 0x15c   : > { %v1155_v16 = vmul.f32 %v1091_v36, %v3035_v33  ;;  %v1092_v46 = vmul.f32 %v3052_v22, %v3052_v22  ;;  %v1502_v62 = vadd.f32 1.0, %v2279_v52  ;;  %v1249_v5 = vmul.f32 0.044715, %v1185_v24 }
 0x15d   : > { %v1218_v47 = vmul.f32 0.044715, %v1154_v42  ;;  %v1187_v1 = vmul.f32 %v1123_v44, %v3045_v55  ;;  %v1598_v61 = vmul.f32 %v1534_v32, %v2944_v12  ;;  %2288 = vtanh.f32 %v1345_v34 }
 0x15e   : > { %v2281_v15 = vpop.eup %2280  ;;  %v1250_v54 = vmul.f32 0.044715, %v1186_v59  ;;  %v1219_v28 = vmul.f32 0.044715, %v1155_v16  ;;  %v1566_v27 = vmul.f32 0.5, %v1502_v62  ;;  %v1313_v45 = vadd.f32 %v1249_v5, %v3021_v25 }
 0x15f   : > { %v2283_v2 = vpop.eup %2282  ;;  %v1471_v38 = vadd.f32 1.0, %v2281_v15  ;;  %v1282_v50 = vadd.f32 %v1218_v47, %v3025_v43  ;;  %v2095_v19 = vpack.c.bf16 %v1598_v61, %v1597_v7  ;;  %v1156_v52 = vmul.f32 %v1092_v46, %v3052_v22 }
 0x160   : > { %v1503_v40 = vadd.f32 1.0, %v2283_v2  ;;  %v1314_v48 = vadd.f32 %v1250_v54, %v3029_v29  ;;  %v1283_v9 = vadd.f32 %v1219_v28, %v3035_v33  ;;  %v1630_v12 = vmul.f32 %v1566_v27, %v2954_v0 }
 0x161   : > { %v2285_v23 = vpop.eup %2284  ;;  %v1535_v26 = vmul.f32 0.5, %v1471_v38  ;;  %v1377_v37 = vmul.f32 0.7978846, %v1313_v45  ;;  %v1346_v57 = vmul.f32 0.7978846, %v1282_v50  ;;  %1846 = vst [vmem:[%s2749_s7 + $0x38] sm:$0xff] %v2095_v19  ;;  %v3076_v32 = vadd.f32 %v2586_v31, %v2798_v6 }
 0x162   : > { %v2287_v58 = vpop.eup %2286  ;;  %v1567_v49 = vmul.f32 0.5, %v1503_v40  ;;  %v1472_v4 = vadd.f32 1.0, %v2285_v23  ;;  %v1378_v53 = vmul.f32 0.7978846, %v1314_v48  ;;  %v1347_v60 = vmul.f32 0.7978846, %v1283_v9 }
 0x163   : > { %v2111_v36 = vpack.c.bf16 %v1630_v12, %v1629_v20  ;;  %v1599_v7 = vmul.f32 %v1535_v26, %v2971_v35  ;;  %v1504_v24 = vadd.f32 1.0, %v2287_v58  ;;  %2290 = vtanh.f32 %v1377_v37 }
 0x164   : > { %v1631_v42 = vmul.f32 %v1567_v49, %v2975_v17  ;;  %v1536_v59 = vmul.f32 0.5, %v1472_v4  ;;  %2292 = vtanh.f32 %v1346_v57  ;;  %v1251_v0 = vmul.f32 0.044715, %v1187_v1 }
 0x165   : > { %1862 = vst [vmem:[%s2749_s7 + $0xb8] sm:$0xff] %v2111_v36  ;;  %v1568_v44 = vmul.f32 0.5, %v1504_v24  ;;  %2294 = vtanh.f32 %v1378_v53  ;;  %v3082_v17 = vadd.f32 %v2584_v30, %v2801_v10  ;;  %v1220_v16 = vmul.f32 0.044715, %v1156_v52 }
 0x166   : > { %v1600_v20 = vmul.f32 %v1536_v59, %v2987_v13  ;;  %2296 = vtanh.f32 %v1347_v60  ;;  %v1315_v35 = vadd.f32 %v1251_v0, %v3045_v55  ;;  %v1124_v46 = vmul.f32 %v3076_v32, %v3076_v32 }
 0x167   : > { %v1632_v34 = vmul.f32 %v1568_v44, %v2993_v3  ;;  %v3089_v6 = vadd.f32 %v2584_v30, %v2803_v11  ;;  %v2289_v13 = vpop.eup %2288  ;;  %v1093_v47 = vmul.f32 %v3082_v17, %v3082_v17  ;;  %v3095_v10 = vadd.f32 %v2586_v31, %v2809_v56 }
 0x168   : > { %v2096_v62 = vpack.c.bf16 %v1600_v20, %v1599_v7  ;;  %v1379_v5 = vmul.f32 0.7978846, %v1315_v35  ;;  %v1473_v1 = vadd.f32 1.0, %v2289_v13  ;;  %v1284_v15 = vadd.f32 %v1220_v16, %v3052_v22 }
 0x169   : > { %v2112_v3 = vpack.c.bf16 %v1632_v34, %v1631_v42  ;;  %v1188_v61 = vmul.f32 %v1124_v46, %v3076_v32  ;;  %v1157_v11 = vmul.f32 %v1093_v47, %v3082_v17  ;;  %v1125_v54 = vmul.f32 %v3089_v6, %v3089_v6 }
 0x16a   : > { %1847 = vst [vmem:[%s2749_s7 + $0x40] sm:$0xff] %v2096_v62  ;;  %2298 = vtanh.f32 %v1379_v5  ;;  %v1094_v28 = vmul.f32 %v3095_v10, %v3095_v10  ;;  %v1537_v2 = vmul.f32 0.5, %v1473_v1  ;;  %v1348_v56 = vmul.f32 0.7978846, %v1284_v15 }
 0x16b   : > { %1863 = vst [vmem:[%s2749_s7 + $0xc0] sm:$0xff] %v2112_v3  ;;  %v1252_v27 = vmul.f32 0.044715, %v1188_v61  ;;  %v3108_v38 = vadd.f32 %v2586_v31, %v2811_v41  ;;  %v1221_v45 = vmul.f32 0.044715, %v1157_v11  ;;  %v1189_v50 = vmul.f32 %v1125_v54, %v3089_v6 }
 0x16c   : > { %v1158_v19 = vmul.f32 %v1094_v28, %v3095_v10  ;;  %v3114_v40 = vadd.f32 %v2584_v30, %v2846_v39  ;;  %v1601_v9 = vmul.f32 %v1537_v2, %v2997_v63  ;;  %2300 = vtanh.f32 %v1348_v56 }
 0x16d   : > { %v2291_v48 = vpop.eup %2290  ;;  %v1316_v23 = vadd.f32 %v1252_v27, %v3076_v32  ;;  %v1126_v12 = vmul.f32 %v3108_v38, %v3108_v38  ;;  %v1285_v37 = vadd.f32 %v1221_v45, %v3082_v17  ;;  %v1253_v57 = vmul.f32 0.044715, %v1189_v50 }
 0x16e   : > { %v2293_v41 = vpop.eup %2292  ;;  %v1505_v26 = vadd.f32 1.0, %v2291_v48  ;;  %v1222_v58 = vmul.f32 0.044715, %v1158_v19  ;;  %v1095_v63 = vmul.f32 %v3114_v40, %v3114_v40  ;;  %v3132_v3 = vadd.f32 %v2584_v30, %v2848_v18 }
 0x16f   : > { %v2295_v49 = vpop.eup %2294  ;;  %v1474_v4 = vadd.f32 1.0, %v2293_v41  ;;  %v1380_v53 = vmul.f32 0.7978846, %v1316_v23  ;;  %v1190_v39 = vmul.f32 %v1126_v12, %v3108_v38  ;;  %v1349_v24 = vmul.f32 0.7978846, %v1285_v37  ;;  %v3363_v37 = vld [vmem:[#allocation6_spill] sm:$0xff] }
 0x170   : > { %v2297_v60 = vpop.eup %2296  ;;  %v1569_v36 = vmul.f32 0.5, %v1505_v26  ;;  %v1506_v7 = vadd.f32 1.0, %v2295_v49  ;;  %v1317_v42 = vadd.f32 %v1253_v57, %v3089_v6  ;;  %v1286_v44 = vadd.f32 %v1222_v58, %v3095_v10 }
 0x171   : > { %v1538_v59 = vmul.f32 0.5, %v1474_v4  ;;  %v1475_v0 = vadd.f32 1.0, %v2297_v60  ;;  %2302 = vtanh.f32 %v1380_v53  ;;  %v1254_v13 = vmul.f32 0.044715, %v1190_v39 }
 0x172   : > { %v1633_v52 = vmul.f32 %v1569_v36, %v3021_v25  ;;  %v1570_v20 = vmul.f32 0.5, %v1506_v7  ;;  %2304 = vtanh.f32 %v1349_v24  ;;  %v1381_v35 = vmul.f32 0.7978846, %v1317_v42 }
 0x173   : > { %v1602_v34 = vmul.f32 %v1538_v59, %v3025_v43  ;;  %v1539_v16 = vmul.f32 0.5, %v1475_v0  ;;  %v1350_v46 = vmul.f32 0.7978846, %v1286_v44  ;;  %v1159_v47 = vmul.f32 %v1095_v63, %v3114_v40 }
 0x174   : > { %v2299_v62 = vpop.eup %2298  ;;  %v1634_v5 = vmul.f32 %v1570_v20, %v3029_v29  ;;  %2306 = vtanh.f32 %v1381_v35  ;;  %v1318_v61 = vadd.f32 %v1254_v13, %v3108_v38  ;;  %v1127_v29 = vmul.f32 %v3132_v3, %v3132_v3 }
 0x175   : > { %v2097_v25 = vpack.c.bf16 %v1602_v34, %v1601_v9  ;;  %v1603_v1 = vmul.f32 %v1539_v16, %v3035_v33  ;;  %v1507_v15 = vadd.f32 1.0, %v2299_v62  ;;  %2308 = vtanh.f32 %v1350_v46 }
 0x176   : > { %v2113_v43 = vpack.c.bf16 %v1634_v5, %v1633_v52  ;;  %v1223_v11 = vmul.f32 0.044715, %v1159_v47  ;;  %v2301_v54 = vpop.eup %2300  ;;  %v3141_v2 = vadd.f32 %v2586_v31, %v2859_v8  ;;  %v3145_v18 = vadd.f32 %v2586_v31, %v2861_v51 }
 0x177   : > { %1848 = vst [vmem:[%s2749_s7 + $0x48] sm:$0xff] %v2097_v25  ;;  %v1571_v28 = vmul.f32 0.5, %v1507_v15  ;;  %v3149_v33 = vadd.f32 %v2584_v30, %v2866_v14  ;;  %v1476_v56 = vadd.f32 1.0, %v2301_v54  ;;  %v1382_v27 = vmul.f32 0.7978846, %v1318_v61 }
 0x178   : > { %1864 = vst [vmem:[%s2749_s7 + $0xc8] sm:$0xff] %v2113_v43  ;;  %v1287_v45 = vadd.f32 %v1223_v11, %v3114_v40  ;;  %v1191_v50 = vmul.f32 %v1127_v29, %v3132_v3  ;;  %v1096_v8 = vmul.f32 %v3141_v2, %v3141_v2  ;;  %v1128_v51 = vmul.f32 %v3145_v18, %v3145_v18  ;;  %v3364_v11 = vld [vmem:[#allocation7_spill] sm:$0xff] }
 0x179   : > { %v1635_v19 = vmul.f32 %v1571_v28, %v3045_v55  ;;  %v1097_v48 = vmul.f32 %v3149_v33, %v3149_v33  ;;  %v1540_v14 = vmul.f32 0.5, %v1476_v56  ;;  %2310 = vtanh.f32 %v1382_v27  ;;  %v3365_v56 = vld [vmem:[#allocation8_spill] sm:$0xff] }
 0x17a   : > { %v1351_v9 = vmul.f32 0.7978846, %v1287_v45  ;;  %v1255_v23 = vmul.f32 0.044715, %v1191_v50  ;;  %v1160_v41 = vmul.f32 %v1096_v8, %v3141_v2  ;;  %v1192_v26 = vmul.f32 %v1128_v51, %v3145_v18  ;;  %v3366_v51 = vld [vmem:[#allocation9_spill] sm:$0xff] }
 0x17b   : > { %v2303_v12 = vpop.eup %2302  ;;  %v1161_v55 = vmul.f32 %v1097_v48, %v3149_v33  ;;  %v3166_v57 = vadd.f32 %v2584_v30, %v3363_v37  ;;  %v1604_v49 = vmul.f32 %v1540_v14, %v3052_v22  ;;  %v3186_v29 = vadd.f32 %v2586_v31, %v2876_v21  ;;  %v3367_v37 = vld [vmem:[#allocation10_spill] sm:$0xff] }
 0x17c   : > { %v2305_v58 = vpop.eup %2304  ;;  %v1508_v4 = vadd.f32 1.0, %v2303_v12  ;;  %2312 = vtanh.f32 %v1351_v9  ;;  %v1319_v53 = vadd.f32 %v1255_v23, %v3132_v3  ;;  %v1224_v63 = vmul.f32 0.044715, %v1160_v41 }
 0x17d   : > { %v1477_v39 = vadd.f32 1.0, %v2305_v58  ;;  %v1256_v60 = vmul.f32 0.044715, %v1192_v26  ;;  %v1129_v36 = vmul.f32 %v3166_v57, %v3166_v57  ;;  %v2098_v24 = vpack.c.bf16 %v1604_v49, %v1603_v1 }
 0x17e   : > { %v2307_v7 = vpop.eup %2306  ;;  %v1572_v42 = vmul.f32 0.5, %v1508_v4  ;;  %v1383_v59 = vmul.f32 0.7978846, %v1319_v53  ;;  %v1225_v0 = vmul.f32 0.044715, %v1161_v55  ;;  %v1288_v22 = vadd.f32 %v1224_v63, %v3141_v2 }
 0x17f   : > { %v2309_v44 = vpop.eup %2308  ;;  %v1541_v52 = vmul.f32 0.5, %v1477_v39  ;;  %v1509_v20 = vadd.f32 1.0, %v2307_v7  ;;  %v1320_v35 = vadd.f32 %v1256_v60, %v3145_v18  ;;  %1849 = vst [vmem:[%s2749_s7 + $0x50] sm:$0xff] %v2098_v24  ;;  %v1193_v43 = vmul.f32 %v1129_v36, %v3166_v57 }
 0x180   : > { %v1636_v34 = vmul.f32 %v1572_v42, %v3076_v32  ;;  %v1478_v16 = vadd.f32 1.0, %v2309_v44  ;;  %2314 = vtanh.f32 %v1383_v59  ;;  %v1289_v46 = vadd.f32 %v1225_v0, %v3149_v33 }
 0x181   : > { %v1605_v13 = vmul.f32 %v1541_v52, %v3082_v17  ;;  %v1573_v62 = vmul.f32 0.5, %v1509_v20  ;;  %v1352_v5 = vmul.f32 0.7978846, %v1288_v22  ;;  %v1384_v47 = vmul.f32 0.7978846, %v1320_v35 }
 0x182   : > { %v2114_v25 = vpack.c.bf16 %v1636_v34, %v1635_v19  ;;  %v1542_v1 = vmul.f32 0.5, %v1478_v16  ;;  %v1353_v15 = vmul.f32 0.7978846, %v1289_v46  ;;  %v3182_v32 = vadd.f32 %v2586_v31, %v3364_v11  ;;  %v3368_v34 = vld [vmem:[#allocation11_spill] sm:$0xff]  ;;  %v3369_v46 = vld [vmem:[#allocation12_spill] sm:$0xff] }
 0x183   : > { %v1637_v61 = vmul.f32 %v1573_v62, %v3089_v6  ;;  %2316 = vtanh.f32 %v1352_v5  ;;  %v2311_v17 = vpop.eup %2310  ;;  %v1257_v28 = vmul.f32 0.044715, %v1193_v43  ;;  %v3192_v27 = vadd.f32 %v2584_v30, %v3365_v56 }
 0x184   : > { %1865 = vst [vmem:[%s2749_s7 + $0xd0] sm:$0xff] %v2114_v25  ;;  %v1606_v54 = vmul.f32 %v1542_v1, %v3095_v10  ;;  %2318 = vtanh.f32 %v1384_v47  ;;  %v1510_v6 = vadd.f32 1.0, %v2311_v17  ;;  %v1098_v45 = vmul.f32 %v3182_v32, %v3182_v32 }
 0x185   : > { %2320 = vtanh.f32 %v1353_v15  ;;  %v1130_v21 = vmul.f32 %v3186_v29, %v3186_v29  ;;  %v1321_v8 = vadd.f32 %v1257_v28, %v3166_v57  ;;  %v1099_v10 = vmul.f32 %v3192_v27, %v3192_v27 }
 0x186   : > { %v2313_v50 = vpop.eup %2312  ;;  %v2099_v19 = vpack.c.bf16 %v1606_v54, %v1605_v13  ;;  %v3203_v48 = vadd.f32 %v2584_v30, %v3366_v51  ;;  %v1574_v14 = vmul.f32 0.5, %v1510_v6  ;;  %v1162_v23 = vmul.f32 %v1098_v45, %v3182_v32 }
 0x187   : > { %v1479_v9 = vadd.f32 1.0, %v2313_v50  ;;  %v1194_v12 = vmul.f32 %v1130_v21, %v3186_v29  ;;  %v1385_v41 = vmul.f32 0.7978846, %v1321_v8  ;;  %v1163_v26 = vmul.f32 %v1099_v10, %v3192_v27  ;;  %v3370_v10 = vld [vmem:[#allocation13_spill] sm:$0xff] }
 0x188   : > { %1850 = vst [vmem:[%s2749_s7 + $0x58] sm:$0xff] %v2099_v19  ;;  %v1131_v55 = vmul.f32 %v3203_v48, %v3203_v48  ;;  %v3213_v58 = vadd.f32 %v2586_v31, %v3367_v37  ;;  %v1638_v49 = vmul.f32 %v1574_v14, %v3108_v38  ;;  %v1226_v4 = vmul.f32 0.044715, %v1162_v23  ;;  %v3371_v23 = vld [vmem:[#allocation14_spill] sm:$0xff] }
 0x189   : > { %v1258_v53 = vmul.f32 0.044715, %v1194_v12  ;;  %2322 = vtanh.f32 %v1385_v41  ;;  %v1227_v63 = vmul.f32 0.044715, %v1163_v26  ;;  %v1543_v24 = vmul.f32 0.5, %v1479_v9 }
 0x18a   : > { %v2315_v39 = vpop.eup %2314  ;;  %v1195_v60 = vmul.f32 %v1131_v55, %v3203_v48  ;;  %v1100_v36 = vmul.f32 %v3213_v58, %v3213_v58  ;;  %v2115_v7 = vpack.c.bf16 %v1638_v49, %v1637_v61  ;;  %v1290_v59 = vadd.f32 %v1226_v4, %v3182_v32  ;;  %v3372_v49 = vld [vmem:[#allocation15_spill] sm:$0xff] }
 0x18b   : > { %v1511_v42 = vadd.f32 1.0, %v2315_v39  ;;  %v1322_v0 = vadd.f32 %v1258_v53, %v3186_v29  ;;  %v1291_v38 = vadd.f32 %v1227_v63, %v3192_v27  ;;  %v3226_v16 = vadd.f32 %v2586_v31, %v3368_v34 }
 0x18c   : > { %v1259_v44 = vmul.f32 0.044715, %v1195_v60  ;;  %v1164_v52 = vmul.f32 %v1100_v36, %v3213_v58  ;;  %1866 = vst [vmem:[%s2749_s7 + $0xd8] sm:$0xff] %v2115_v7  ;;  %v1354_v35 = vmul.f32 0.7978846, %v1290_v59  ;;  %v3230_v13 = vadd.f32 %v2584_v30, %v3369_v46 }
 0x18d   : > { %v2317_v20 = vpop.eup %2316  ;;  %v1575_v22 = vmul.f32 0.5, %v1511_v42  ;;  %v1386_v47 = vmul.f32 0.7978846, %v1322_v0  ;;  %v1355_v25 = vmul.f32 0.7978846, %v1291_v38  ;;  %v1607_v43 = vmul.f32 %v1543_v24, %v3114_v40 }
 0x18e   : > { %v2319_v62 = vpop.eup %2318  ;;  %v1480_v5 = vadd.f32 1.0, %v2317_v20  ;;  %v1323_v1 = vadd.f32 %v1259_v44, %v3203_v48  ;;  %2324 = vtanh.f32 %v1354_v35  ;;  %v1228_v11 = vmul.f32 0.044715, %v1164_v52 }
 0x18f   : > { %v2321_v15 = vpop.eup %2320  ;;  %v1512_v61 = vadd.f32 1.0, %v2319_v62  ;;  %v1639_v17 = vmul.f32 %v1575_v22, %v3132_v3  ;;  %2326 = vtanh.f32 %v1386_v47  ;;  %v1132_v45 = vmul.f32 %v3226_v16, %v3226_v16 }
 0x190   : > { %v1544_v54 = vmul.f32 0.5, %v1480_v5  ;;  %v1387_v28 = vmul.f32 0.7978846, %v1323_v1  ;;  %2328 = vtanh.f32 %v1355_v25  ;;  %v1292_v6 = vadd.f32 %v1228_v11, %v3213_v58 }
 0x191   : > { %v1576_v56 = vmul.f32 0.5, %v1512_v61  ;;  %v1481_v50 = vadd.f32 1.0, %v2321_v15  ;;  %v1101_v40 = vmul.f32 %v3230_v13, %v3230_v13  ;;  %v1196_v8 = vmul.f32 %v1132_v45, %v3226_v16 }
 0x192   : > { %v1608_v21 = vmul.f32 %v1544_v54, %v3141_v2  ;;  %2330 = vtanh.f32 %v1387_v28  ;;  %v1356_v19 = vmul.f32 0.7978846, %v1292_v6  ;;  %v3245_v51 = vadd.f32 %v2584_v30, %v3370_v10 }
 0x193   : > { %v1640_v3 = vmul.f32 %v1576_v56, %v3145_v18  ;;  %v2323_v14 = vpop.eup %2322  ;;  %v1165_v2 = vmul.f32 %v1101_v40, %v3230_v13  ;;  %v3250_v12 = vadd.f32 %v2586_v31, %v3371_v23  ;;  %v1260_v18 = vmul.f32 0.044715, %v1196_v8 }
 0x194   : > { %v2100_v9 = vpack.c.bf16 %v1608_v21, %v1607_v43  ;;  %v1513_v26 = vadd.f32 1.0, %v2323_v14  ;;  %2332 = vtanh.f32 %v1356_v19  ;;  %v1133_v37 = vmul.f32 %v3245_v51, %v3245_v51 }
 0x195   : > { %v2116_v41 = vpack.c.bf16 %v1640_v3, %v1639_v17  ;;  %v1229_v55 = vmul.f32 0.044715, %v1165_v2  ;;  %v1102_v30 = vmul.f32 %v3250_v12, %v3250_v12  ;;  %v3259_v4 = vadd.f32 %v2586_v31, %v3372_v49 }
 0x196   : > { %1851 = vst [vmem:[%s2749_s7 + $0x60] sm:$0xff] %v2100_v9  ;;  %v1545_v53 = vmul.f32 0.5, %v1481_v50  ;;  %v1324_v39 = vadd.f32 %v1260_v18, %v3226_v16  ;;  %v1197_v60 = vmul.f32 %v1133_v37, %v3245_v51  ;;  %v1577_v42 = vmul.f32 0.5, %v1513_v26 }
 0x197   : > { %1867 = vst [vmem:[%s2749_s7 + $0xe0] sm:$0xff] %v2116_v41  ;;  %v1293_v63 = vadd.f32 %v1229_v55, %v3230_v13  ;;  %v1166_v36 = vmul.f32 %v1102_v30, %v3250_v12  ;;  %v1134_v7 = vmul.f32 %v3259_v4, %v3259_v4 }
 0x198   : > { %v2325_v24 = vpop.eup %2324  ;;  %v1388_v59 = vmul.f32 0.7978846, %v1324_v39  ;;  %v1261_v44 = vmul.f32 0.044715, %v1197_v60  ;;  %v1609_v22 = vmul.f32 %v1545_v53, %v3149_v33  ;;  %v1641_v25 = vmul.f32 %v1577_v42, %v3166_v57 }
 0x199   : > { %v2327_v0 = vpop.eup %2326  ;;  %v1482_v38 = vadd.f32 1.0, %v2325_v24  ;;  %v1357_v31 = vmul.f32 0.7978846, %v1293_v63  ;;  %v1198_v52 = vmul.f32 %v1134_v7, %v3259_v4  ;;  %v1230_v34 = vmul.f32 0.044715, %v1166_v36 }
 0x19a   : > { %v2329_v20 = vpop.eup %2328  ;;  %v1514_v35 = vadd.f32 1.0, %v2327_v0  ;;  %2334 = vtanh.f32 %v1388_v59  ;;  %v1325_v47 = vadd.f32 %v1261_v44, %v3245_v51 }
 0x19b   : > { %v1546_v62 = vmul.f32 0.5, %v1482_v38  ;;  %v1483_v5 = vadd.f32 1.0, %v2329_v20  ;;  %2336 = vtanh.f32 %v1357_v31  ;;  %v1294_v15 = vadd.f32 %v1230_v34, %v3250_v12 }
 0x19c   : > { %v2331_v46 = vpop.eup %2330  ;;  %v1578_v1 = vmul.f32 0.5, %v1514_v35  ;;  %v1262_v43 = vmul.f32 0.044715, %v1198_v52  ;;  %v1389_v33 = vmul.f32 0.7978846, %v1325_v47 }
 0x19d   : > { %v1610_v61 = vmul.f32 %v1546_v62, %v3182_v32  ;;  %v1547_v11 = vmul.f32 0.5, %v1483_v5  ;;  %v1358_v28 = vmul.f32 0.7978846, %v1294_v15  ;;  %v1515_v45 = vadd.f32 1.0, %v2331_v46 }
 0x19e   : > { %v2333_v17 = vpop.eup %2332  ;;  %v1642_v54 = vmul.f32 %v1578_v1, %v3186_v29  ;;  %v1326_v56 = vadd.f32 %v1262_v43, %v3259_v4  ;;  %2338 = vtanh.f32 %v1389_v33 }
 0x19f   : > { %v2101_v6 = vpack.c.bf16 %v1610_v61, %v1609_v22  ;;  %v1484_v21 = vadd.f32 1.0, %v2333_v17  ;;  %2340 = vtanh.f32 %v1358_v28  ;;  %v1611_v32 = vmul.f32 %v1547_v11, %v3192_v27 }
 0x1a0   : > { %v2117_v57 = vpack.c.bf16 %v1642_v54, %v1641_v25  ;;  %v1390_v50 = vmul.f32 0.7978846, %v1326_v56  ;;  %v1579_v3 = vmul.f32 0.5, %v1515_v45 }
 0x1a1   : > { %1852 = vst [vmem:[%s2749_s7 + $0x68] sm:$0xff] %v2101_v6  ;;  %v1548_v40 = vmul.f32 0.5, %v1484_v21 }
 0x1a2   : > { %1868 = vst [vmem:[%s2749_s7 + $0xe8] sm:$0xff] %v2117_v57  ;;  %2342 = vtanh.f32 %v1390_v50  ;;  %v1643_v2 = vmul.f32 %v1579_v3, %v3203_v48 }
 0x1a3   : > { %v1612_v29 = vmul.f32 %v1548_v40, %v3213_v58 }
 0x1a4   : > { %v2335_v19 = vpop.eup %2334 }
 0x1a5   : > { %v2337_v8 = vpop.eup %2336  ;;  %v2102_v10 = vpack.c.bf16 %v1612_v29, %v1611_v32  ;;  %v1516_v14 = vadd.f32 1.0, %v2335_v19 }
 0x1a6   : > { %v1485_v9 = vadd.f32 1.0, %v2337_v8 }
 0x1a7   : > { %1853 = vst [vmem:[%s2749_s7 + $0x70] sm:$0xff] %v2102_v10  ;;  %v1580_v23 = vmul.f32 0.5, %v1516_v14 }
 0x1a8   : > { %v2339_v41 = vpop.eup %2338  ;;  %v1549_v26 = vmul.f32 0.5, %v1485_v9 }
 0x1a9   : > { %v1644_v27 = vmul.f32 %v1580_v23, %v3226_v16  ;;  %v2341_v18 = vpop.eup %2340  ;;  %v1517_v55 = vadd.f32 1.0, %v2339_v41 }
 0x1aa   : > { %v1486_v58 = vadd.f32 1.0, %v2341_v18  ;;  %v1613_v48 = vmul.f32 %v1549_v26, %v3230_v13 }
 0x1ab   : > { %v2118_v37 = vpack.c.bf16 %v1644_v27, %v1643_v2  ;;  %v1581_v49 = vmul.f32 0.5, %v1517_v55 }
 0x1ac   : > { %v2343_v30 = vpop.eup %2342  ;;  %v1550_v53 = vmul.f32 0.5, %v1486_v58 }
 0x1ad   : > { %1869 = vst [vmem:[%s2749_s7 + $0xf0] sm:$0xff] %v2118_v37  ;;  %v1518_v39 = vadd.f32 1.0, %v2343_v30  ;;  %v1645_v63 = vmul.f32 %v1581_v49, %v3245_v51 }
 0x1ae   : > { %v1614_v16 = vmul.f32 %v1550_v53, %v3250_v12 }
 0x1af   : > { %v1582_v60 = vmul.f32 0.5, %v1518_v39 }
 0x1b0   : > { %v2103_v36 = vpack.c.bf16 %v1614_v16, %v1613_v48 }
 0x1b1   : > { %v1646_v7 = vmul.f32 %v1582_v60, %v3259_v4 }
 0x1b2   : > { %1854 = vst [vmem:[%s2749_s7 + $0x78] sm:$0xff] %v2103_v36 }
 0x1b3   : > { %v2119_v13 = vpack.c.bf16 %v1646_v7, %v1645_v63 }
 0x1b5   : > { %1870 = vst [vmem:[%s2749_s7 + $0xf8] sm:$0xff] %v2119_v13 }
 0x1b6   : > { %2357 = shalt.err (!%p2354_p5)
}
 0x1b7   : > { %s2358_s27 = scalar_lea.hbm %s3293_s18, 4096  ;;  %s2362_s30 = scalar_lea.hbm %s3350_s3, 8192 }
 0x1b8   : > { %p2359_p6 = scmp.ne.s32.totalorder %s3293_s18, %s2358_s27  ;;  %p2363_p10 = scmp.lt.u32.totalorder %s3293_s18, %s3350_s3 }
 0x1b9   : > { %p2364_p11 = scmp.lt.u32.totalorder %s2362_s30, %s2358_s27  ;;  %p2366_p13 = scmp.lt.u32.totalorder %s2358_s27, %s3293_s18 }
 0x1ba   : > { %p2360_p7 = pnand %p2359_p6, %p2488_p4 }
 0x1bb   : > { %p2365_p12 = por %p2364_p11, %p2363_p10 }
 0x1bc   : > { %p2361_p9 = pneg %p2360_p7 }
 0x1bd   : > { %p2367_p0 = por %p2366_p13, %p2365_p12 }
 0x1bf   : > { %p2368_p1 = pnand %p2367_p0, %p2361_p9 }
 0x1c1   : > { %2371 = shalt.err (!%p2368_p1)
}
 0x1c2   : > { %s2426_s6 = smov 128   ;;  %s2427_s7 = smov 8  }
 0x1c3   : > { %2130 = dma.vmem_to_hbm [thread:$0]  (%p2488_p4), %s3295_s9, 4096, %s3293_s18, %s3301_s19, %s2426_s6, %s2426_s6, %s2427_s7  }
 0x1c4 PF: > { %p2136_p2 = scmp.ge.s32.totalorder %s2422_s17, 2  ;;  %s1903_s8 = sand.u32 1, %s2402_s12  }
 0x1c5   : > { %s1904_s10 = scalar_lea.sflag [#allocation4], %s1903_s8 }
 0x1c6   : > { %p2133_p3 = pnand %p2136_p2, %p2495_p8 }
 0x1c8   : > { %2397 = dma.done.wait (!%p2133_p3), %s1904_s10, 4096  }
 0x1c9   : > { %2399 = vsyncadd (!%p2133_p3), %s1904_s10, 4294963200  ;;  %s16_s17 = sadd.s32 1, %s2422_s17   ;;  %s3373_s12 = smov %s2406_s13 }
 0x1ca   : > { %p13_p5 = scmp.ge.s32.totalorder %s16_s17, 4   ;;  %s3374_s13 = smov %s2410_s14 }
 0x1cb   : > { %s3375_s14 = smov %s2501_s25  ;;  %s3376_s15 = smov %s2418_s16 }
 0x1cc   : > { %s3377_s16 = smov %s3379_s20  ;;  %15 = sbr.rel (!%p13_p5) target bundleno = 4 (0x4), region = 81 }
 0x1d3   :  { %1909 = vsyncpa [#allocation4], 1 }
 0x1d4   :  { %1911 = vsyncpa [#allocation4 + $0x1], 1 }

</bundles_post_ra>
